<compile_context>
chip_gen: v6e
topology: v6e:2x2x1
jax: 0.10.0
libtpu: 0.0.40
codegen_flags: <defaults>
</compile_context>

<pallas_src>
import jax
import jax.numpy as jnp
from jax.scipy.linalg import block_diag
from jax.experimental import pallas as pl

# ----------------------------- model config ---------------------------------
NUM_FEATURES = 8
DIM = 32
N_FACTOR = 4
N_DIM = DIM // N_FACTOR          # 8
N_LAYER = 2
N_CLASS = 3

N_NODES = 16
N_EDGES = 32
N_GRAPHS = 2

D4 = N_FACTOR * N_DIM            # 32  (all factors side-by-side)
LANES = N_FACTOR * DIM           # 128 (slab lane width == one vreg row)


def _round8(n):
    return ((n + 7) // 8) * 8


# ---- weight-slab row offsets (single lane-dense f32 [SLAB_ROWS, 128]) -------
R_W0 = 0                                   # [F, 128]   lin0, all factors
R_WATT = R_W0 + NUM_FEATURES               # [128, 8]   att weights (src|dst halves)
R_WE = R_WATT + N_FACTOR * DIM             # [F, 32]    encoder linears
R_WCONV = R_WE + NUM_FEATURES              # N_LAYER x [64, 32]   (rel ; root)
R_WG = R_WCONV + N_LAYER * 2 * D4          # [64, 128]  GRU (x ; h), gates [r|z|n_in|n_hid]
R_W1 = R_WG + 2 * D4                       # [32, 32]   fc1
R_W2 = R_W1 + DIM                          # [32, 3]    fc2
R_BIAS = R_W2 + DIM                        # bias block, one row per bias
N_BIAS_ROWS = 6 + N_LAYER                  # b0, bg, ba, be, brel_l..., b1, b2
SLAB_ROWS = R_BIAS + _round8(N_BIAS_ROWS)  # 408

# ---- packed int32 index block / packed output slab --------------------------
IDX_ROWS = _round8(N_EDGES + 2)            # 40
OUT_ROWS = _round8(N_EDGES + N_GRAPHS)     # 40


# ------------------------------ fused kernel --------------------------------
def _fused_net_kernel(idx_ref, x_ref, w_ref, out_ref):
    f32 = jnp.float32
    E, N, B = N_EDGES, N_NODES, N_GRAPHS

    x = x_ref[...]                                                   # [N, F]

    # ---- static zero-cost views into the single weight slab ----
    w0 = w_ref[R_W0:R_W0 + NUM_FEATURES, :]                          # [F, 128]
    watt = w_ref[R_WATT:R_WATT + N_FACTOR * DIM, 0:2 * N_FACTOR]     # [128, 8]
    we = w_ref[R_WE:R_WE + NUM_FEATURES, 0:D4]                       # [F, 32]
    wg = w_ref[R_WG:R_WG + 2 * D4, :]                                # [64, 128]
    w1 = w_ref[R_W1:R_W1 + DIM, 0:DIM]                               # [32, 32]
    w2 = w_ref[R_W2:R_W2 + DIM, 0:N_CLASS]                           # [32, 3]
    b0 = w_ref[R_BIAS + 0:R_BIAS + 1, :]                             # [1, 128]
    bg = w_ref[R_BIAS + 1:R_BIAS + 2, :]                             # [1, 128]
    ba = w_ref[R_BIAS + 2:R_BIAS + 3, 0:N_FACTOR]                    # [1, 4]
    be = w_ref[R_BIAS + 3:R_BIAS + 4, 0:D4]                          # [1, 32]
    b1 = w_ref[R_BIAS + 4 + N_LAYER:R_BIAS + 5 + N_LAYER, 0:DIM]     # [1, 32]
    b2 = w_ref[R_BIAS + 5 + N_LAYER:R_BIAS + 6 + N_LAYER, 0:N_CLASS]  # [1, 3]

    # ---- one-hot selector matrices from the single packed int32 block ----
    src_c = idx_ref[0:E, 0:1]           # [E, 1]  src node of each edge
    dst_c = idx_ref[0:E, 1:2]           # [E, 1]  dst node of each edge
    dst_r = idx_ref[E:E + 1, 0:E]       # [1, E]  dst, row form (scatter side)
    bat_r = idx_ref[E + 1:E + 2, 0:N]   # [1, N]  graph id per node

    col_n = jax.lax.broadcasted_iota(jnp.int32, (E, N), 1)
    s_src = (src_c == col_n).astype(f32)                             # [E, N] gather src
    s_dst = (dst_c == col_n).astype(f32)                             # [E, N] gather dst
    row_n = jax.lax.broadcasted_iota(jnp.int32, (N, E), 0)
    s_dst_t = (row_n == dst_r).astype(f32)                           # [N, E] scatter-add
    row_b = jax.lax.broadcasted_iota(jnp.int32, (B, N), 0)
    pool_oh = (row_b == bat_r).astype(f32)                           # [B, N]
    counts = jnp.maximum(jnp.sum(pool_oh, axis=1, keepdims=True), 1.0)
    pool_mat = pool_oh / counts        # exact divide (tolerance headroom is small)

    # ---- edge attention: all 4 factors in one lane-dense pass ----
    h_all = jnp.dot(x, w0, preferred_element_type=f32) + b0          # [N, 128]
    z = jnp.dot(h_all, watt, preferred_element_type=f32)             # [N, 8] = [src|dst]
    att_logits = (jnp.dot(s_src, z[:, 0:N_FACTOR], preferred_element_type=f32)
                  + jnp.dot(s_dst, z[:, N_FACTOR:2 * N_FACTOR],
                            preferred_element_type=f32)
                  + ba)                                               # [E, 4]
    att = jax.nn.sigmoid(6.0 * att_logits)
    # per-factor lane broadcast 4 -> 32 cols (VPU/XLU only, no MXU push)
    att_wide = jnp.concatenate(
        [jnp.broadcast_to(att[:, i:i + 1], (E, N_DIM)) for i in range(N_FACTOR)],
        axis=1)                                                       # [E, 32]

    # ---- DisentangleEncoder: factors batched along lanes, K-stacked weights ----
    out = jnp.dot(x, we, preferred_element_type=f32) + be            # [N, 32]
    h = out
    for l in range(N_LAYER):
        wconv_l = w_ref[R_WCONV + 2 * D4 * l:R_WCONV + 2 * D4 * (l + 1), 0:D4]  # [64,32]
        brel_l = w_ref[R_BIAS + 4 + l:R_BIAS + 5 + l, 0:D4]                      # [1,32]
        # GraphConv: agg[n] = sum_{e: dst(e)=n} att[e] * out[src(e)]
        x_src = jnp.dot(s_src, out, preferred_element_type=f32)                  # [E, 32]
        agg = jnp.dot(s_dst_t, att_wide * x_src, preferred_element_type=f32)     # [N, 32]
        m = jnp.maximum(
            jnp.dot(jnp.concatenate([agg, out], axis=1), wconv_l,
                    preferred_element_type=f32) + brel_l, 0.0)                   # [N, 32]
        # single-step GRU; gate columns packed as [r | z | n_in | n_hid]
        g = jnp.dot(jnp.concatenate([m, h], axis=1), wg,
                    preferred_element_type=f32) + bg                             # [N, 128]
        rz = jax.nn.sigmoid(g[:, 0:2 * D4])          # one 64-lane sigmoid for r|z
        r, zt = rz[:, 0:D4], rz[:, D4:2 * D4]
        n = jnp.tanh(g[:, 2 * D4:3 * D4] + r * g[:, 3 * D4:4 * D4])
        h = (1.0 - zt) * n + zt * h
        out = h

    # ---- global mean pool + classifier head ----
    pooled = jnp.dot(pool_mat, out, preferred_element_type=f32)                  # [B, 32]
    hdn = jnp.maximum(jnp.dot(pooled, w1, preferred_element_type=f32) + b1, 0.0)
    pred = jnp.dot(hdn, w2, preferred_element_type=f32) + b2                     # [B, 3]

    # ---- single lane-dense output slab: one unmasked store, one writeback DMA ----
    att_blk = jnp.concatenate([att, jnp.zeros((E, LANES - N_FACTOR), f32)], axis=1)
    head_blk = jnp.concatenate(
        [pooled, pred, jnp.zeros((B, LANES - DIM - N_CLASS), f32)], axis=1)
    pad_blk = jnp.zeros((OUT_ROWS - E - B, LANES), f32)
    out_ref[...] = jnp.concatenate([att_blk, head_blk, pad_blk], axis=0)


# ------------------------------ parameters ----------------------------------
def init_params(key):
    ks = iter(jax.random.split(key, 256))

    def mat(shape, scale=0.1):
        return scale * jax.random.normal(next(ks), shape, jnp.float32)

    p = {"lin0": [], "att": [], "enc_lin": [], "conv": [], "gru": []}
    for _ in range(N_FACTOR):
        p["lin0"].append((mat((NUM_FEATURES, DIM)), jnp.zeros((DIM,), jnp.float32)))
        p["att"].append((mat((2 * DIM, 1)), jnp.zeros((1,), jnp.float32)))
        p["enc_lin"].append((mat((NUM_FEATURES, N_DIM)), jnp.zeros((N_DIM,), jnp.float32)))
        # per layer: (w_rel, b_rel, w_root)  (root has no bias, like PyG GraphConv)
        p["conv"].append([(mat((N_DIM, N_DIM)), jnp.zeros((N_DIM,), jnp.float32),
                           mat((N_DIM, N_DIM))) for _ in range(N_LAYER)])
        # GRU (gate order r, z, n), weights stored [in, 3*hidden]; biases random
        # (torch only zeroes nn.Linear biases in init_emb).
        p["gru"].append((mat((N_DIM, 3 * N_DIM)), mat((3 * N_DIM,)),
                         mat((N_DIM, 3 * N_DIM)), mat((3 * N_DIM,))))
    p["fc1"] = (mat((DIM, DIM)), jnp.zeros((DIM,), jnp.float32))
    p["fc2"] = (mat((DIM, N_CLASS)), jnp.zeros((N_CLASS,), jnp.float32))
    return p


def pack_params(p):
    """Pack all weights/biases into ONE lane-dense f32 slab [SLAB_ROWS, 128]."""
    f32 = jnp.float32

    # lin0: all factors side-by-side along lanes
    w0 = jnp.concatenate([p["lin0"][i][0] for i in range(N_FACTOR)], axis=1)   # [F, 128]
    b0 = jnp.concatenate([p["lin0"][i][1] for i in range(N_FACTOR)])           # [128]

    # attention: block-diagonal src/dst halves merged into one [128, 8] weight
    watt = jnp.zeros((N_FACTOR * DIM, 2 * N_FACTOR), f32)
    ba = jnp.zeros((N_FACTOR,), f32)
    for i in range(N_FACTOR):
        wa, b = p["att"][i]
        watt = watt.at[i * DIM:(i + 1) * DIM, i].set(wa[:DIM, 0])
        watt = watt.at[i * DIM:(i + 1) * DIM, N_FACTOR + i].set(wa[DIM:, 0])
        ba = ba.at[i].set(b[0])

    we = jnp.concatenate([p["enc_lin"][i][0] for i in range(N_FACTOR)], axis=1)  # [F, 32]
    be = jnp.concatenate([p["enc_lin"][i][1] for i in range(N_FACTOR)])          # [32]

    # GraphConv per layer: block-diag rel/root, K-stacked -> [64, 32]
    wconv, brel = [], []
    for l in range(N_LAYER):
        wrel = block_diag(*[p["conv"][i][l][0] for i in range(N_FACTOR)])
        wroot = block_diag(*[p["conv"][i][l][2] for i in range(N_FACTOR)])
        wconv.append(jnp.concatenate([wrel, wroot], axis=0))                     # [64, 32]
        brel.append(jnp.concatenate([p["conv"][i][l][1] for i in range(N_FACTOR)]))

    # GRU: gate-packed [r | z | n_in | n_hid], K-stacked (x rows ; h rows) -> [64, 128]
    wgx = jnp.zeros((D4, 4 * D4), f32)
    wgh = jnp.zeros((D4, 4 * D4), f32)
    bg = jnp.zeros((4 * D4,), f32)
    for i in range(N_FACTOR):
        wih, bih, whh, bhh = p["gru"][i]
        r0, r1 = i * N_DIM, (i + 1) * N_DIM
        # r gate
        wgx = wgx.at[r0:r1, 0 * D4 + r0:0 * D4 + r1].set(wih[:, 0:N_DIM])
        wgh = wgh.at[r0:r1, 0 * D4 + r0:0 * D4 + r1].set(whh[:, 0:N_DIM])
        bg = bg.at[0 * D4 + r0:0 * D4 + r1].set(bih[0:N_DIM] + bhh[0:N_DIM])
        # z gate
        wgx = wgx.at[r0:r1, 1 * D4 + r0:1 * D4 + r1].set(wih[:, N_DIM:2 * N_DIM])
        wgh = wgh.at[r0:r1, 1 * D4 + r0:1 * D4 + r1].set(whh[:, N_DIM:2 * N_DIM])
        bg = bg.at[1 * D4 + r0:1 * D4 + r1].set(bih[N_DIM:2 * N_DIM] + bhh[N_DIM:2 * N_DIM])
        # n gate, input part
        wgx = wgx.at[r0:r1, 2 * D4 + r0:2 * D4 + r1].set(wih[:, 2 * N_DIM:3 * N_DIM])
        bg = bg.at[2 * D4 + r0:2 * D4 + r1].set(bih[2 * N_DIM:3 * N_DIM])
        # n gate, hidden part
        wgh = wgh.at[r0:r1, 3 * D4 + r0:3 * D4 + r1].set(whh[:, 2 * N_DIM:3 * N_DIM])
        bg = bg.at[3 * D4 + r0:3 * D4 + r1].set(bhh[2 * N_DIM:3 * N_DIM])
    wg = jnp.concatenate([wgx, wgh], axis=0)                                      # [64, 128]

    w1, b1 = p["fc1"]
    w2, b2 = p["fc2"]

    def pad_lanes(a):
        if a.shape[1] == LANES:
            return a
        return jnp.concatenate([a, jnp.zeros((a.shape[0], LANES - a.shape[1]), f32)],
                               axis=1)

    bias_blk = jnp.zeros((SLAB_ROWS - R_BIAS, LANES), f32)
    bias_blk = bias_blk.at[0, :].set(b0)
    bias_blk = bias_blk.at[1, :].set(bg)
    bias_blk = bias_blk.at[2, 0:N_FACTOR].set(ba)
    bias_blk = bias_blk.at[3, 0:D4].set(be)
    for l in range(N_LAYER):
        bias_blk = bias_blk.at[4 + l, 0:D4].set(brel[l])
    bias_blk = bias_blk.at[4 + N_LAYER, 0:DIM].set(b1)
    bias_blk = bias_blk.at[5 + N_LAYER, 0:N_CLASS].set(b2)

    slab = jnp.concatenate(
        [pad_lanes(w0), pad_lanes(watt), pad_lanes(we)]
        + [pad_lanes(wconv[l]) for l in range(N_LAYER)]
        + [pad_lanes(wg), pad_lanes(w1), pad_lanes(w2), bias_blk], axis=0)
    assert slab.shape == (SLAB_ROWS, LANES)
    return slab


# ------------------------------ forward pass ---------------------------------
@jax.jit
def net_forward(slab, x, edge_index, batch):
    E, N = edge_index.shape[1], x.shape[0]
    # single packed int32 index block:
    #   rows 0:E, lanes {0,1} = (src, dst) column form (gather side)
    #   row  E,   lanes 0:E   = dst row form (scatter side)
    #   row  E+1, lanes 0:N   = batch (graph id per node)
    idx = jnp.zeros((IDX_ROWS, LANES), jnp.int32)
    idx = idx.at[0:E, 0].set(edge_index[0].astype(jnp.int32))
    idx = idx.at[0:E, 1].set(edge_index[1].astype(jnp.int32))
    idx = idx.at[E, 0:E].set(edge_index[1].astype(jnp.int32))
    idx = idx.at[E + 1, 0:N].set(batch.astype(jnp.int32))

    out = pl.pallas_call(
        _fused_net_kernel,
        out_shape=jax.ShapeDtypeStruct((OUT_ROWS, LANES), jnp.float32),
    )(idx, x.astype(jnp.float32), slab)

    att = out[0:E, 0:N_FACTOR]
    pooled = out[E:E + N_GRAPHS, 0:DIM]
    pred = out[E:E + N_GRAPHS, DIM:DIM + N_CLASS]
    att_list = [att[:, i] for i in range(N_FACTOR)]
    out_list = [pooled[:, i * N_DIM:(i + 1) * N_DIM] for i in range(N_FACTOR)]
    return pred, att_list, out_list


# --------------------- pure-JAX reference (per-factor) -----------------------
def reference_forward(params, x, edge_index, batch):
    hi = jax.lax.Precision.HIGHEST
    src, dst = edge_index[0], edge_index[1]
    N = x.shape[0]
    onehot = (batch[None, :] == jnp.arange(N_GRAPHS)[:, None]).astype(jnp.float32)
    P = onehot / jnp.maximum(onehot.sum(axis=1, keepdims=True), 1.0)
    att_list, out_list = [], []
    for fi in range(N_FACTOR):
        w0, b0 = params["lin0"][fi]
        h_all = jnp.dot(x, w0, precision=hi) + b0
        wa, ba = params["att"][fi]
        cat = jnp.concatenate([h_all[src], h_all[dst]], axis=-1)
        att_i = jax.nn.sigmoid(6.0 * (jnp.dot(cat, wa, precision=hi)[:, 0] + ba[0]))
        att_list.append(att_i)
        A = jnp.zeros((N, N), jnp.float32).at[dst, src].add(att_i)
        we, be = params["enc_lin"][fi]
        out = jnp.dot(x, we, precision=hi) + be
        h = out
        wih, bih, whh, bhh = params["gru"][fi]
        for lj in range(N_LAYER):
            wrel, brel, wroot = params["conv"][fi][lj]
            agg = jnp.dot(A, out, precision=hi)
            m = jnp.maximum(jnp.dot(agg, wrel, precision=hi) + brel
                            + jnp.dot(out, wroot, precision=hi), 0.0)
            gi = jnp.dot(m, wih, precision=hi) + bih
            gh = jnp.dot(h, whh, precision=hi) + bhh
            d = N_DIM
            r = jax.nn.sigmoid(gi[:, :d] + gh[:, :d])
            z = jax.nn.sigmoid(gi[:, d:2 * d] + gh[:, d:2 * d])
            n = jnp.tanh(gi[:, 2 * d:] + r * gh[:, 2 * d:])
            h = (1.0 - z) * n + z * h
            out = h
        out_list.append(jnp.dot(P, out, precision=hi))
    out_cat = jnp.concatenate(out_list, axis=-1)
    w1, b1 = params["fc1"]
    w2, b2 = params["fc2"]
    hdn = jnp.maximum(jnp.dot(out_cat, w1, precision=hi) + b1, 0.0)
    pred = jnp.dot(hdn, w2, precision=hi) + b2
    return pred, att_list, out_list


# ---------------------------------- main -------------------------------------
if __name__ == "__main__":
    key = jax.random.PRNGKey(0)
    kx, ke, kp = jax.random.split(key, 3)

    x = jax.random.normal(kx, (N_NODES, NUM_FEATURES), jnp.float32)
    edge_index = jax.random.randint(ke, (2, N_EDGES), 0, N_NODES, jnp.int32)
    batch = jnp.concatenate([
        jnp.zeros((N_NODES // 2,), jnp.int32),
        jnp.ones((N_NODES - N_NODES // 2,), jnp.int32),
    ])

    params = init_params(kp)
    packed = pack_params(params)

    pred, att, out_ = net_forward(packed, x, edge_index, batch)
    jax.block_until_ready(pred)
    jax.block_until_ready(att)
    jax.block_until_ready(out_)

    assert pred.shape == (N_GRAPHS, N_CLASS)
    assert all(a.shape == (N_EDGES,) for a in att)
    assert all(o.shape == (N_GRAPHS, N_DIM) for o in out_)

    # correctness vs. per-factor pure-JAX reference of the PyTorch semantics
    pred_r, att_r, out_r = reference_forward(params, x, edge_index, batch)
    assert jnp.allclose(pred, pred_r, atol=3e-3, rtol=3e-2), "pred mismatch"
    assert all(jnp.allclose(a, b, atol=3e-3, rtol=3e-2) for a, b in zip(att, att_r)), "att mismatch"
    assert all(jnp.allclose(a, b, atol=3e-3, rtol=3e-2) for a, b in zip(out_, out_r)), "pool mismatch"

    print("KERNEL_OK")
</pallas_src>

<mosaic_0001>
module attributes {stable_mosaic.version = 11 : i64} {
  func.func @_fused_net_kernel(%arg0: memref<40x128xi32, #tpu.memory_space<vmem>>, %arg1: memref<16x8xf32, #tpu.memory_space<vmem>>, %arg2: memref<408x128xf32, #tpu.memory_space<vmem>>, %arg3: memref<40x128xf32, #tpu.memory_space<vmem>>) attributes {dimension_semantics = [], scalar_prefetch = 0 : i64, scratch_operands = 0 : i64, tpu.core_type = #tpu.core_type<tc>} {
    %c0 = arith.constant 0 : index
    %c0_0 = arith.constant 0 : index
    %0 = vector.load %arg1[%c0, %c0_0] : memref<16x8xf32, #tpu.memory_space<vmem>>, vector<16x8xf32>
    %c0_1 = arith.constant 0 : index
    %c0_2 = arith.constant 0 : index
    %1 = vector.load %arg2[%c0_1, %c0_2] : memref<408x128xf32, #tpu.memory_space<vmem>>, vector<8x128xf32>
    %c8 = arith.constant 8 : index
    %c0_3 = arith.constant 0 : index
    %2 = vector.load %arg2[%c8, %c0_3] : memref<408x128xf32, #tpu.memory_space<vmem>>, vector<128x8xf32>
    %c136 = arith.constant 136 : index
    %c0_4 = arith.constant 0 : index
    %3 = vector.load %arg2[%c136, %c0_4] : memref<408x128xf32, #tpu.memory_space<vmem>>, vector<8x32xf32>
    %c272 = arith.constant 272 : index
    %c0_5 = arith.constant 0 : index
    %4 = vector.load %arg2[%c272, %c0_5] : memref<408x128xf32, #tpu.memory_space<vmem>>, vector<64x128xf32>
    %c336 = arith.constant 336 : index
    %c0_6 = arith.constant 0 : index
    %5 = vector.load %arg2[%c336, %c0_6] : memref<408x128xf32, #tpu.memory_space<vmem>>, vector<32x32xf32>
    %c368 = arith.constant 368 : index
    %c0_7 = arith.constant 0 : index
    %6 = vector.load %arg2[%c368, %c0_7] : memref<408x128xf32, #tpu.memory_space<vmem>>, vector<32x3xf32>
    %c400 = arith.constant 400 : index
    %c0_8 = arith.constant 0 : index
    %7 = vector.load %arg2[%c400, %c0_8] : memref<408x128xf32, #tpu.memory_space<vmem>>, vector<1x128xf32>
    %c401 = arith.constant 401 : index
    %c0_9 = arith.constant 0 : index
    %8 = vector.load %arg2[%c401, %c0_9] : memref<408x128xf32, #tpu.memory_space<vmem>>, vector<1x128xf32>
    %c402 = arith.constant 402 : index
    %c0_10 = arith.constant 0 : index
    %9 = vector.load %arg2[%c402, %c0_10] : memref<408x128xf32, #tpu.memory_space<vmem>>, vector<1x4xf32>
    %c403 = arith.constant 403 : index
    %c0_11 = arith.constant 0 : index
    %10 = vector.load %arg2[%c403, %c0_11] : memref<408x128xf32, #tpu.memory_space<vmem>>, vector<1x32xf32>
    %c406 = arith.constant 406 : index
    %c0_12 = arith.constant 0 : index
    %11 = vector.load %arg2[%c406, %c0_12] : memref<408x128xf32, #tpu.memory_space<vmem>>, vector<1x32xf32>
    %c407 = arith.constant 407 : index
    %c0_13 = arith.constant 0 : index
    %12 = vector.load %arg2[%c407, %c0_13] : memref<408x128xf32, #tpu.memory_space<vmem>>, vector<1x3xf32>
    %c0_14 = arith.constant 0 : index
    %c0_15 = arith.constant 0 : index
    %13 = vector.load %arg0[%c0_14, %c0_15] : memref<40x128xi32, #tpu.memory_space<vmem>>, vector<32x1xi32>
    %c0_16 = arith.constant 0 : index
    %c1 = arith.constant 1 : index
    %14 = vector.load %arg0[%c0_16, %c1] : memref<40x128xi32, #tpu.memory_space<vmem>>, vector<32x1xi32>
    %c32 = arith.constant 32 : index
    %c0_17 = arith.constant 0 : index
    %15 = vector.load %arg0[%c32, %c0_17] : memref<40x128xi32, #tpu.memory_space<vmem>>, vector<1x32xi32>
    %c33 = arith.constant 33 : index
    %c0_18 = arith.constant 0 : index
    %16 = vector.load %arg0[%c33, %c0_18] : memref<40x128xi32, #tpu.memory_space<vmem>>, vector<1x16xi32>
    %17 = tpu.iota {dimensions = array<i32: 1>} : vector<32x16xi32>
    %18 = vector.broadcast %13 : vector<32x1xi32> to vector<32x16xi32>
    %19 = arith.cmpi eq, %18, %17 : vector<32x16xi32>
    %20 = arith.extui %19 : vector<32x16xi1> to vector<32x16xi32>
    %21 = arith.sitofp %20 : vector<32x16xi32> to vector<32x16xf32>
    %22 = vector.broadcast %14 : vector<32x1xi32> to vector<32x16xi32>
    %23 = arith.cmpi eq, %22, %17 : vector<32x16xi32>
    %24 = arith.extui %23 : vector<32x16xi1> to vector<32x16xi32>
    %25 = arith.sitofp %24 : vector<32x16xi32> to vector<32x16xf32>
    %26 = tpu.iota {dimensions = array<i32: 0>} : vector<16x32xi32>
    %27 = vector.broadcast %15 : vector<1x32xi32> to vector<16x32xi32>
    %28 = arith.cmpi eq, %26, %27 : vector<16x32xi32>
    %29 = arith.extui %28 : vector<16x32xi1> to vector<16x32xi32>
    %30 = arith.sitofp %29 : vector<16x32xi32> to vector<16x32xf32>
    %31 = tpu.iota {dimensions = array<i32: 0>} : vector<2x16xi32>
    %32 = vector.broadcast %16 : vector<1x16xi32> to vector<2x16xi32>
    %33 = arith.cmpi eq, %31, %32 : vector<2x16xi32>
    %34 = arith.extui %33 : vector<2x16xi1> to vector<2x16xi32>
    %35 = arith.sitofp %34 : vector<2x16xi32> to vector<2x16xf32>
    %cst = arith.constant dense<0.000000e+00> : vector<2xf32>
    %36 = vector.multi_reduction <add>, %35, %cst [1] : vector<2x16xf32> to vector<2xf32>
    %37 = vector.shape_cast %36 : vector<2xf32> to vector<2x1xf32>
    %cst_19 = arith.constant 1.000000e+00 : f32
    %38 = vector.broadcast %cst_19 : f32 to vector<2x1xf32>
    %39 = arith.maximumf %37, %38 : vector<2x1xf32>
    %40 = vector.broadcast %39 : vector<2x1xf32> to vector<2x16xf32>
    %41 = arith.divf %35, %40 : vector<2x16xf32>
    %cst_20 = arith.constant dense<0.000000e+00> : vector<16x128xf32>
    %42 = tpu.matmul %0, %1, %cst_20 {dimension_numbers = #tpu.dot_dimension_numbers<[1], [0], [0], [1], [0, 0, 1, 1], [], []>} : vector<16x8xf32>, vector<8x128xf32>, vector<16x128xf32> -> vector<16x128xf32>
    %43 = vector.broadcast %7 : vector<1x128xf32> to vector<16x128xf32>
    %44 = arith.addf %42, %43 : vector<16x128xf32>
    %cst_21 = arith.constant dense<0.000000e+00> : vector<16x8xf32>
    %45 = tpu.matmul %44, %2, %cst_21 {dimension_numbers = #tpu.dot_dimension_numbers<[1], [0], [0], [1], [0, 0, 1, 1], [], []>} : vector<16x128xf32>, vector<128x8xf32>, vector<16x8xf32> -> vector<16x8xf32>
    %46 = vector.extract_strided_slice %45 {offsets = [0, 0], sizes = [16, 4], strides = [1, 1]} : vector<16x8xf32> to vector<16x4xf32>
    %cst_22 = arith.constant dense<0.000000e+00> : vector<32x4xf32>
    %47 = tpu.matmul %21, %46, %cst_22 {dimension_numbers = #tpu.dot_dimension_numbers<[1], [0], [0], [1], [0, 0, 1, 1], [], []>} : vector<32x16xf32>, vector<16x4xf32>, vector<32x4xf32> -> vector<32x4xf32>
    %48 = vector.extract_strided_slice %45 {offsets = [0, 4], sizes = [16, 4], strides = [1, 1]} : vector<16x8xf32> to vector<16x4xf32>
    %cst_23 = arith.constant dense<0.000000e+00> : vector<32x4xf32>
    %49 = tpu.matmul %25, %48, %cst_23 {dimension_numbers = #tpu.dot_dimension_numbers<[1], [0], [0], [1], [0, 0, 1, 1], [], []>} : vector<32x16xf32>, vector<16x4xf32>, vector<32x4xf32> -> vector<32x4xf32>
    %50 = arith.addf %47, %49 : vector<32x4xf32>
    %51 = vector.broadcast %9 : vector<1x4xf32> to vector<32x4xf32>
    %52 = arith.addf %50, %51 : vector<32x4xf32>
    %cst_24 = arith.constant 6.000000e+00 : f32
    %53 = vector.broadcast %cst_24 : f32 to vector<32x4xf32>
    %54 = arith.mulf %53, %52 : vector<32x4xf32>
    %55 = arith.negf %54 : vector<32x4xf32>
    %56 = math.exp %55 : vector<32x4xf32>
    %cst_25 = arith.constant 1.000000e+00 : f32
    %57 = vector.broadcast %cst_25 : f32 to vector<32x4xf32>
    %58 = arith.addf %57, %56 : vector<32x4xf32>
    %59 = arith.divf %57, %58 : vector<32x4xf32>
    %60 = vector.extract_strided_slice %59 {offsets = [0, 0], sizes = [32, 1], strides = [1, 1]} : vector<32x4xf32> to vector<32x1xf32>
    %61 = vector.shape_cast %60 : vector<32x1xf32> to vector<32x1xf32>
    %62 = vector.broadcast %61 : vector<32x1xf32> to vector<32x8xf32>
    %63 = vector.extract_strided_slice %59 {offsets = [0, 1], sizes = [32, 1], strides = [1, 1]} : vector<32x4xf32> to vector<32x1xf32>
    %64 = vector.shape_cast %63 : vector<32x1xf32> to vector<32x1xf32>
    %65 = vector.broadcast %64 : vector<32x1xf32> to vector<32x8xf32>
    %66 = vector.extract_strided_slice %59 {offsets = [0, 2], sizes = [32, 1], strides = [1, 1]} : vector<32x4xf32> to vector<32x1xf32>
    %67 = vector.shape_cast %66 : vector<32x1xf32> to vector<32x1xf32>
    %68 = vector.broadcast %67 : vector<32x1xf32> to vector<32x8xf32>
    %69 = vector.extract_strided_slice %59 {offsets = [0, 3], sizes = [32, 1], strides = [1, 1]} : vector<32x4xf32> to vector<32x1xf32>
    %70 = vector.shape_cast %69 : vector<32x1xf32> to vector<32x1xf32>
    %71 = vector.broadcast %70 : vector<32x1xf32> to vector<32x8xf32>
    %72 = tpu.concatenate %62, %65, %68, %71 in 1 : vector<32x8xf32>, vector<32x8xf32>, vector<32x8xf32>, vector<32x8xf32> -> vector<32x32xf32>
    %cst_26 = arith.constant dense<0.000000e+00> : vector<16x32xf32>
    %73 = tpu.matmul %0, %3, %cst_26 {dimension_numbers = #tpu.dot_dimension_numbers<[1], [0], [0], [1], [0, 0, 1, 1], [], []>} : vector<16x8xf32>, vector<8x32xf32>, vector<16x32xf32> -> vector<16x32xf32>
    %74 = vector.broadcast %10 : vector<1x32xf32> to vector<16x32xf32>
    %75 = arith.addf %73, %74 : vector<16x32xf32>
    %c144 = arith.constant 144 : index
    %c0_27 = arith.constant 0 : index
    %76 = vector.load %arg2[%c144, %c0_27] : memref<408x128xf32, #tpu.memory_space<vmem>>, vector<64x32xf32>
    %c404 = arith.constant 404 : index
    %c0_28 = arith.constant 0 : index
    %77 = vector.load %arg2[%c404, %c0_28] : memref<408x128xf32, #tpu.memory_space<vmem>>, vector<1x32xf32>
    %cst_29 = arith.constant dense<0.000000e+00> : vector<32x32xf32>
    %78 = tpu.matmul %21, %75, %cst_29 {dimension_numbers = #tpu.dot_dimension_numbers<[1], [0], [0], [1], [0, 0, 1, 1], [], []>} : vector<32x16xf32>, vector<16x32xf32>, vector<32x32xf32> -> vector<32x32xf32>
    %79 = arith.mulf %72, %78 : vector<32x32xf32>
    %cst_30 = arith.constant dense<0.000000e+00> : vector<16x32xf32>
    %80 = tpu.matmul %30, %79, %cst_30 {dimension_numbers = #tpu.dot_dimension_numbers<[1], [0], [0], [1], [0, 0, 1, 1], [], []>} : vector<16x32xf32>, vector<32x32xf32>, vector<16x32xf32> -> vector<16x32xf32>
    %81 = tpu.concatenate %80, %75 in 1 : vector<16x32xf32>, vector<16x32xf32> -> vector<16x64xf32>
    %cst_31 = arith.constant dense<0.000000e+00> : vector<16x32xf32>
    %82 = tpu.matmul %81, %76, %cst_31 {dimension_numbers = #tpu.dot_dimension_numbers<[1], [0], [0], [1], [0, 0, 1, 1], [], []>} : vector<16x64xf32>, vector<64x32xf32>, vector<16x32xf32> -> vector<16x32xf32>
    %83 = vector.broadcast %77 : vector<1x32xf32> to vector<16x32xf32>
    %84 = arith.addf %82, %83 : vector<16x32xf32>
    %cst_32 = arith.constant 0.000000e+00 : f32
    %85 = vector.broadcast %cst_32 : f32 to vector<16x32xf32>
    %86 = arith.maximumf %84, %85 : vector<16x32xf32>
    %87 = tpu.concatenate %86, %75 in 1 : vector<16x32xf32>, vector<16x32xf32> -> vector<16x64xf32>
    %cst_33 = arith.constant dense<0.000000e+00> : vector<16x128xf32>
    %88 = tpu.matmul %87, %4, %cst_33 {dimension_numbers = #tpu.dot_dimension_numbers<[1], [0], [0], [1], [0, 0, 1, 1], [], []>} : vector<16x64xf32>, vector<64x128xf32>, vector<16x128xf32> -> vector<16x128xf32>
    %89 = vector.broadcast %8 : vector<1x128xf32> to vector<16x128xf32>
    %90 = arith.addf %88, %89 : vector<16x128xf32>
    %91 = vector.extract_strided_slice %90 {offsets = [0, 0], sizes = [16, 64], strides = [1, 1]} : vector<16x128xf32> to vector<16x64xf32>
    %92 = arith.negf %91 : vector<16x64xf32>
    %93 = math.exp %92 : vector<16x64xf32>
    %cst_34 = arith.constant 1.000000e+00 : f32
    %94 = vector.broadcast %cst_34 : f32 to vector<16x64xf32>
    %95 = arith.addf %94, %93 : vector<16x64xf32>
    %96 = arith.divf %94, %95 : vector<16x64xf32>
    %97 = vector.extract_strided_slice %96 {offsets = [0, 0], sizes = [16, 32], strides = [1, 1]} : vector<16x64xf32> to vector<16x32xf32>
    %98 = vector.extract_strided_slice %96 {offsets = [0, 32], sizes = [16, 32], strides = [1, 1]} : vector<16x64xf32> to vector<16x32xf32>
    %99 = vector.extract_strided_slice %90 {offsets = [0, 64], sizes = [16, 32], strides = [1, 1]} : vector<16x128xf32> to vector<16x32xf32>
    %100 = vector.extract_strided_slice %90 {offsets = [0, 96], sizes = [16, 32], strides = [1, 1]} : vector<16x128xf32> to vector<16x32xf32>
    %101 = arith.mulf %97, %100 : vector<16x32xf32>
    %102 = arith.addf %99, %101 : vector<16x32xf32>
    %103 = math.tanh %102 : vector<16x32xf32>
    %cst_35 = arith.constant 1.000000e+00 : f32
    %104 = vector.broadcast %cst_35 : f32 to vector<16x32xf32>
    %105 = arith.subf %104, %98 : vector<16x32xf32>
    %106 = arith.mulf %105, %103 : vector<16x32xf32>
    %107 = arith.mulf %98, %75 : vector<16x32xf32>
    %108 = arith.addf %106, %107 : vector<16x32xf32>
    %c208 = arith.constant 208 : index
    %c0_36 = arith.constant 0 : index
    %109 = vector.load %arg2[%c208, %c0_36] : memref<408x128xf32, #tpu.memory_space<vmem>>, vector<64x32xf32>
    %c405 = arith.constant 405 : index
    %c0_37 = arith.constant 0 : index
    %110 = vector.load %arg2[%c405, %c0_37] : memref<408x128xf32, #tpu.memory_space<vmem>>, vector<1x32xf32>
    %cst_38 = arith.constant dense<0.000000e+00> : vector<32x32xf32>
    %111 = tpu.matmul %21, %108, %cst_38 {dimension_numbers = #tpu.dot_dimension_numbers<[1], [0], [0], [1], [0, 0, 1, 1], [], []>} : vector<32x16xf32>, vector<16x32xf32>, vector<32x32xf32> -> vector<32x32xf32>
    %112 = arith.mulf %72, %111 : vector<32x32xf32>
    %cst_39 = arith.constant dense<0.000000e+00> : vector<16x32xf32>
    %113 = tpu.matmul %30, %112, %cst_39 {dimension_numbers = #tpu.dot_dimension_numbers<[1], [0], [0], [1], [0, 0, 1, 1], [], []>} : vector<16x32xf32>, vector<32x32xf32>, vector<16x32xf32> -> vector<16x32xf32>
    %114 = tpu.concatenate %113, %108 in 1 : vector<16x32xf32>, vector<16x32xf32> -> vector<16x64xf32>
    %cst_40 = arith.constant dense<0.000000e+00> : vector<16x32xf32>
    %115 = tpu.matmul %114, %109, %cst_40 {dimension_numbers = #tpu.dot_dimension_numbers<[1], [0], [0], [1], [0, 0, 1, 1], [], []>} : vector<16x64xf32>, vector<64x32xf32>, vector<16x32xf32> -> vector<16x32xf32>
    %116 = vector.broadcast %110 : vector<1x32xf32> to vector<16x32xf32>
    %117 = arith.addf %115, %116 : vector<16x32xf32>
    %cst_41 = arith.constant 0.000000e+00 : f32
    %118 = vector.broadcast %cst_41 : f32 to vector<16x32xf32>
    %119 = arith.maximumf %117, %118 : vector<16x32xf32>
    %120 = tpu.concatenate %119, %108 in 1 : vector<16x32xf32>, vector<16x32xf32> -> vector<16x64xf32>
    %cst_42 = arith.constant dense<0.000000e+00> : vector<16x128xf32>
    %121 = tpu.matmul %120, %4, %cst_42 {dimension_numbers = #tpu.dot_dimension_numbers<[1], [0], [0], [1], [0, 0, 1, 1], [], []>} : vector<16x64xf32>, vector<64x128xf32>, vector<16x128xf32> -> vector<16x128xf32>
    %122 = vector.broadcast %8 : vector<1x128xf32> to vector<16x128xf32>
    %123 = arith.addf %121, %122 : vector<16x128xf32>
    %124 = vector.extract_strided_slice %123 {offsets = [0, 0], sizes = [16, 64], strides = [1, 1]} : vector<16x128xf32> to vector<16x64xf32>
    %125 = arith.negf %124 : vector<16x64xf32>
    %126 = math.exp %125 : vector<16x64xf32>
    %cst_43 = arith.constant 1.000000e+00 : f32
    %127 = vector.broadcast %cst_43 : f32 to vector<16x64xf32>
    %128 = arith.addf %127, %126 : vector<16x64xf32>
    %129 = arith.divf %127, %128 : vector<16x64xf32>
    %130 = vector.extract_strided_slice %129 {offsets = [0, 0], sizes = [16, 32], strides = [1, 1]} : vector<16x64xf32> to vector<16x32xf32>
    %131 = vector.extract_strided_slice %129 {offsets = [0, 32], sizes = [16, 32], strides = [1, 1]} : vector<16x64xf32> to vector<16x32xf32>
    %132 = vector.extract_strided_slice %123 {offsets = [0, 64], sizes = [16, 32], strides = [1, 1]} : vector<16x128xf32> to vector<16x32xf32>
    %133 = vector.extract_strided_slice %123 {offsets = [0, 96], sizes = [16, 32], strides = [1, 1]} : vector<16x128xf32> to vector<16x32xf32>
    %134 = arith.mulf %130, %133 : vector<16x32xf32>
    %135 = arith.addf %132, %134 : vector<16x32xf32>
    %136 = math.tanh %135 : vector<16x32xf32>
    %cst_44 = arith.constant 1.000000e+00 : f32
    %137 = vector.broadcast %cst_44 : f32 to vector<16x32xf32>
    %138 = arith.subf %137, %131 : vector<16x32xf32>
    %139 = arith.mulf %138, %136 : vector<16x32xf32>
    %140 = arith.mulf %131, %108 : vector<16x32xf32>
    %141 = arith.addf %139, %140 : vector<16x32xf32>
    %cst_45 = arith.constant dense<0.000000e+00> : vector<2x32xf32>
    %142 = tpu.matmul %41, %141, %cst_45 {dimension_numbers = #tpu.dot_dimension_numbers<[1], [0], [0], [1], [0, 0, 1, 1], [], []>} : vector<2x16xf32>, vector<16x32xf32>, vector<2x32xf32> -> vector<2x32xf32>
    %cst_46 = arith.constant dense<0.000000e+00> : vector<2x32xf32>
    %143 = tpu.matmul %142, %5, %cst_46 {dimension_numbers = #tpu.dot_dimension_numbers<[1], [0], [0], [1], [0, 0, 1, 1], [], []>} : vector<2x32xf32>, vector<32x32xf32>, vector<2x32xf32> -> vector<2x32xf32>
    %144 = vector.broadcast %11 : vector<1x32xf32> to vector<2x32xf32>
    %145 = arith.addf %143, %144 : vector<2x32xf32>
    %cst_47 = arith.constant 0.000000e+00 : f32
    %146 = vector.broadcast %cst_47 : f32 to vector<2x32xf32>
    %147 = arith.maximumf %145, %146 : vector<2x32xf32>
    %cst_48 = arith.constant dense<0.000000e+00> : vector<2x3xf32>
    %148 = tpu.matmul %147, %6, %cst_48 {dimension_numbers = #tpu.dot_dimension_numbers<[1], [0], [0], [1], [0, 0, 1, 1], [], []>} : vector<2x32xf32>, vector<32x3xf32>, vector<2x3xf32> -> vector<2x3xf32>
    %149 = vector.broadcast %12 : vector<1x3xf32> to vector<2x3xf32>
    %150 = arith.addf %148, %149 : vector<2x3xf32>
    %cst_49 = arith.constant 0.000000e+00 : f32
    %151 = vector.broadcast %cst_49 : f32 to vector<32x124xf32>
    %152 = tpu.concatenate %59, %151 in 1 : vector<32x4xf32>, vector<32x124xf32> -> vector<32x128xf32>
    %cst_50 = arith.constant 0.000000e+00 : f32
    %153 = vector.broadcast %cst_50 : f32 to vector<2x93xf32>
    %154 = tpu.concatenate %142, %150, %153 in 1 : vector<2x32xf32>, vector<2x3xf32>, vector<2x93xf32> -> vector<2x128xf32>
    %cst_51 = arith.constant 0.000000e+00 : f32
    %155 = vector.broadcast %cst_51 : f32 to vector<6x128xf32>
    %156 = tpu.concatenate %152, %154, %155 in 0 : vector<32x128xf32>, vector<2x128xf32>, vector<6x128xf32> -> vector<40x128xf32>
    %c0_52 = arith.constant 0 : index
    %c0_53 = arith.constant 0 : index
    %157 = vector.load %arg3[%c0_52, %c0_53] : memref<40x128xf32, #tpu.memory_space<vmem>>, vector<40x128xf32>
    tpu.vector_store %arg3[%c0_52, %c0_53], %156 {strides = array<i32>} : memref<40x128xf32, #tpu.memory_space<vmem>>, vector<40x128xf32>,
    return
  }
}

</mosaic_0001>

<bundles_post_ra>
// kernel: net_forward.1
= control target key start
LH: loop header
LB: loop body
LE: loop exit
PB: predicated region body
PF: predicated region fallthrough
CT: control target
= control target key end

     0   :  { %8 = vsyncpa [#allocation3], 0  ;;  %s2272_s12 = smov [#allocation2]   ;;  %s2610_s0 = inlined_call_operand.vmem [shape: s32[40,128], index: 0, kind: input, shape index: {}]   ;;  %s2611_s1 = inlined_call_operand.vmem [shape: f32[16,8], index: 1, kind: input, shape index: {}]   ;;  %s2612_s2 = inlined_call_operand.hbm [shape: f32[408,128], index: 2, kind: input, shape index: {}]   ;;  %s2613_s3 = inlined_call_operand.vmem [shape: f32[40,128], index: 3, kind: output, shape index: {}]  }
   0x1   :  { %s18_s13 = sshll.u32 %s2272_s12, 4  ;;  %s19_s13 = int_to_ptr.vmem [resolvable:$true] %s18_s13 }
   0x2   :  { %s2258_s14 = scalar_lea.vmem %s19_s13, 6528  ;;  %p2263_p1 = scmp.lt.s32.totalorder %s19_s13, %s19_s13 }
   0x3   :  { %p2259_p0 = scmp.ne.s32.totalorder %s19_s13, %s2258_s14  ;;  %p2264_p2 = scmp.lt.s32.totalorder %s2258_s14, %s2258_s14 }
   0x5   :  { %p2265_p3 = por %p2264_p2, %p2263_p1 }
   0x7   :  { %p2266_p4 = pnand %p2265_p3, %p2259_p0 }
   0x9   :  { %2269 = shalt.err (!%p2266_p4)
}
   0xa   :  { %s2273_s15 = smov 128   ;;  %s2274_s16 = smov 8  }
   0xb   :  { %24 = dma.hbm_to_vmem [thread:$0]  %s2612_s2, 6528, %s19_s13, [#allocation3], %s2273_s15, %s2273_s15, %s2274_s16  }
   0xc   :  { %2270 = dma.done.wait [#allocation3], 6528  }
   0xd   :  { %2271 = vsyncadd [#allocation3], 4294960768  ;;  %vm157_vm0 = vcmask 64512   ;;  %v30_v0 = vld [vmem:[#allocation2] sm:$0xff]  ;;  %v2316_v2 = vld [vmem:[%s2611_s1 + $0x8] sm:$0xff]  ;;  %v2275_v21 = vmov 1   ;;  %v76_v30 = vlaneseq }
   0xe   :  { %v2311_v1 = vld [vmem:[%s2611_s1] sm:$0xff]  ;;  %1968 = vmatprep.subr.mxu0 %v30_v0  ;;  %v45_v4 = vld [vmem:[#allocation2 + $0x78] sm:$0xff]  ;;  %v44_v5 = vld [vmem:[#allocation2 + $0x70] sm:$0xff]  ;;  %2194 = vset.pattern.permute.xlu1 %v2275_v21  ;;  %v2276_v29 = vmov 0   ;;  %v2277_v33 = vmov 0.0   ;;  %vm322_vm2 = vcmask 130048  }
   0xf   :  { %1970 = vmatprep.mubr.msk.f32.mxu0 %vm157_vm0, %v2311_v1  ;;  %v46_v3 = vld [vmem:[#allocation2 + $0x80] sm:$0xff]  ;;  %1969 = vmatpush3.msra.mxu0 %v30_v0  ;;  %v43_v6 = vld [vmem:[#allocation2 + $0x68] sm:$0xff]  ;;  %v41_v8 = vld [vmem:[#allocation2 + $0x58] sm:$0xff]  ;;  %v77_v31 = vand.u32 127, %v76_v30  ;;  %s2278_s29 = smov 124   ;;  %vm1767_vm10 = vcmask 31744  }
  0x10   :  { %1973 = vmatprep.subr.mxu1 %v46_v3  ;;  %1971 = vmatmul.mubr.msk.f32.vlgmr.msra.gmra.mxu0 %vm157_vm0, %v2316_v2  ;;  %v42_v7 = vld [vmem:[#allocation2 + $0x60] sm:$0xff]  ;;  %v40_v9 = vld [vmem:[#allocation2 + $0x50] sm:$0xff]  ;;  %v39_v10 = vld [vmem:[#allocation2 + $0x48] sm:$0xff]  ;;  %s2281_s11 = smov 32   ;;  %vm811_vm12 = vcmask 261120   ;;  %vm629_vm13 = vcmask 195584  }
  0x11   :  { %1974 = vmatpush3.msra.mxu1 %v46_v3  ;;  %v38_v11 = vld [vmem:[#allocation2 + $0x40] sm:$0xff]  ;;  %v37_v12 = vld [vmem:[#allocation2 + $0x38] sm:$0xff]  ;;  %v36_v13 = vld [vmem:[#allocation2 + $0x30] sm:$0xff]  ;;  %2193 = vset.pattern.permute.xlu0 %v2275_v21  ;;  %vm907_vm15 = vcmask 523264   ;;  %s2282_s14 = smov 64   ;;  %s2283_s15 = smov 96  }
  0x12   :  { %1975 = vmatprep.subr.mxu1 %v45_v4  ;;  %v35_v14 = vld [vmem:[#allocation2 + $0x28] sm:$0xff]  ;;  %v34_v15 = vld [vmem:[#allocation2 + $0x20] sm:$0xff]  ;;  %v33_v16 = vld [vmem:[#allocation2 + $0x18] sm:$0xff] }
  0x13   :  { %1976 = vmatpush3.msra.mxu1 %v45_v4  ;;  %v32_v17 = vld [vmem:[#allocation2 + $0x10] sm:$0xff]  ;;  %v31_v18 = vld [vmem:[#allocation2 + $0x8] sm:$0xff]  ;;  %v70_v20 = vld [vmem:[%s2610_s0] sm:$0xff] }
  0x14   :  { %1977 = vmatprep.subr.mxu1 %v44_v5  ;;  %v72_v19 = vld [vmem:[%s2610_s0 + $0x10] sm:$0xff]  ;;  %103 = vperm.xlu0 %2193, %v70_v20   ;;  %v71_v22 = vld [vmem:[%s2610_s0 + $0x8] sm:$0xff]  ;;  %v73_v23 = vld [vmem:[%s2610_s0 + $0x18] sm:$0xff] }
  0x15   :  { %1978 = vmatpush3.msra.mxu1 %v44_v5  ;;  %109 = vperm.xlu1 %2194, %v72_v19   ;;  %v1804_v25 = vld [vmem:[#allocation2 + $0x190] ss:$0 sm:$0xff]  ;;  %v47_v45 = vld [vmem:[#allocation2 + $0x88] sm:$0xff]  ;;  %v1815_v58 = vld [vmem:[#allocation2 + $0x192] ss:$0 sm:$0xff] }
  0x16   :  { %1979 = vmatprep.subr.mxu1 %v43_v6 }
  0x17   :  { %1980 = vmatpush3.msra.mxu1 %v43_v6 }
  0x18   :  { %1981 = vmatprep.subr.mxu1 %v42_v7  ;;  %106 = vperm.xlu0 %2193, %v71_v22  }
  0x19   :  { %1982 = vmatpush3.msra.mxu1 %v42_v7  ;;  %2196 = vset.pattern.permute.xlu1 %v2276_v29  ;;  %v1820_v7 = vld [vmem:[#allocation2 + $0x193] ss:$0 sm:$0xff] }
  0x1a   :  { %1983 = vmatprep.subr.mxu1 %v41_v8 }
  0x1b   :  { %1984 = vmatpush3.msra.mxu1 %v41_v8 }
  0x1c   :  { %1985 = vmatprep.subr.mxu1 %v40_v9  ;;  %112 = vperm.xlu0 %2193, %v73_v23  }
  0x1d   :  { %1986 = vmatpush3.msra.mxu1 %v40_v9 }
  0x1e   :  { %1987 = vmatprep.subr.mxu1 %v39_v10 }
  0x1f   :  { %1988 = vmatpush3.msra.mxu1 %v39_v10 }
  0x20   :  { %1989 = vmatprep.subr.mxu1 %v38_v11  ;;  %2195 = vset.pattern.permute.xlu0 %v2276_v29 }
  0x21   :  { %1990 = vmatpush3.msra.mxu1 %v38_v11  ;;  %79 = vperm.xlu0 %2195, %v70_v20  }
  0x22   :  { %1991 = vmatprep.subr.mxu1 %v37_v12 }
  0x23   :  { %1992 = vmatpush3.msra.mxu1 %v37_v12 }
  0x24   :  { %1993 = vmatprep.subr.mxu1 %v36_v13 }
  0x25   :  { %1994 = vmatpush3.msra.mxu1 %v36_v13  ;;  %88 = vperm.xlu0 %2195, %v73_v23  }
  0x26   :  { %1995 = vmatprep.subr.mxu1 %v35_v14 }
  0x27   :  { %1996 = vmatpush3.msra.mxu1 %v35_v14 }
  0x28   :  { %1997 = vmatprep.subr.mxu1 %v34_v15 }
  0x29   :  { %1998 = vmatpush3.msra.mxu1 %v34_v15  ;;  %2200 = vset.pattern.permute.xlu0 %v2275_v21 }
  0x2a   :  { %1999 = vmatprep.subr.mxu1 %v33_v16 }
  0x2b   :  { %2000 = vmatpush3.msra.mxu1 %v33_v16 }
  0x2c   :  { %2001 = vmatprep.subr.mxu1 %v32_v17 }
  0x2d   :  { %2002 = vmatpush3.msra.mxu1 %v32_v17 }
  0x2e   :  { %2003 = vmatprep.subr.mxu1 %v31_v18 }
  0x2f   :  { %2004 = vmatpush3.msra.mxu1 %v31_v18 }
  0x8f   :  { %v104_v32 = vpop.permute.xlu0 %103 }
  0x90   :  { %vm114_vm1 = vcmp.eq.s32.totalorder %v104_v32, %v77_v31  ;;  %v110_v37 = vpop.permute.xlu1 %109 }
  0x91   :  { %v1795_v34 = vsel %vm114_vm1, 1.0, %v2277_v33  ;;  %vm116_vm4 = vcmp.eq.s32.totalorder %v110_v37, %v77_v31  ;;  %vm146_vm1 = vcmask 123904  }
  0x92   :  { %2012 = vmatprep.mubr.msk.f32.mxu0 %vm322_vm2, %v1795_v34  ;;  %v1797_v44 = vsel %vm116_vm4, 1.0, %v2277_v33  ;;  %vm1779_vm4 = vcmask 1041408  }
  0x93   :  { %v107_v38 = vpop.permute.xlu0 %106 }
  0x94   :  { %vm115_vm3 = vcmp.eq.s32.totalorder %v107_v38, %v77_v31 }
  0x95   :  { %v1796_v41 = vsel %vm115_vm3, 1.0, %v2277_v33  ;;  %vm2284_vm3 = vmmov 0  }
  0x97   :  { %v113_v40 = vpop.permute.xlu0 %112 }
  0x98   :  { %vm117_vm6 = vcmp.eq.s32.totalorder %v113_v40, %v77_v31  ;;  %v2279_v40 = vmov 2  }
  0x99   :  { %v1798_v47 = vsel %vm117_vm6, 1.0, %v2277_v33 }
  0x9c   :  { %v80_v43 = vpop.permute.xlu0 %79 }
  0x9d   :  { %vm90_vm5 = vcmp.eq.s32.totalorder %v80_v43, %v77_v31  ;;  %v719_v43 = vld [vmem:[#allocation2 + $0xc0] sm:$0xff] }
  0x9e   :  { %v2347_v46 = vsel %vm90_vm5, 1.0, %v2277_v33 }
  0xa0   :  { %v89_v49 = vpop.permute.xlu0 %88 }
  0xa1   :  { %vm93_vm8 = vcmp.eq.s32.totalorder %v89_v49, %v77_v31 }
  0xa2   :  { %v2362_v53 = vsel %vm93_vm8, 1.0, %v2277_v33 }
  0xd0   :  { %v1972_v24 = vpop.f32.mrf.mxu0 }
  0xd1   :  { %v236_v28 = vadd.f32 %v1972_v24, %v1804_v25 }
  0xd2   :  { %v230_v26 = vpop.f32.mrf.mxu0 }
  0xd3   :  { %v231_v27 = vadd.f32 %v1804_v25, %v230_v26 }
  0xd5   :  { %2005 = vmatprep.mubr.f32.mxu1 %v231_v27 }
  0xd6   :  { %2006 = vmatmul.mubr.f32.vlgmr.msra.gmra.mxu1 %v236_v28 }
 0x196   :  { %v2007_v35 = vpop.f32.mrf.mxu1 }
 0x197   :  { %318 = vrot.lane.b32.xlu1 %v2007_v35, %s2278_s29 }
 0x198   :  { %v305_v36 = vpop.f32.mrf.mxu1 }
 0x19b   :  { %316 = vrot.lane.b32.xlu1 %v305_v36, %s2278_s29 }
 0x19f   :  { %82 = vperm.xlu1 %2196, %v71_v22  }
 0x1a3   :  { %85 = vperm.xlu1 %2196, %v72_v19  }
 0x209   :  { %v319_v39 = vpop.permute.xlu1 %318 }
 0x20a   :  { %2008 = vmatprep.subr.mxu0 %v319_v39 }
 0x20b   :  { %2009 = vmatpush3.msra.mxu0 %v319_v39 }
 0x20d   :  { %v317_v42 = vpop.permute.xlu1 %316 }
 0x20e   :  { %2010 = vmatprep.subr.mxu0 %v317_v42 }
 0x20f   :  { %2011 = vmatpush3.msra.mxu0 %v317_v42  ;;  %v2417_v42 = vld [vmem:[%s2610_s0 + $0x20] ss:$0 sm:$0xff] }
 0x210   :  { %2013 = vmatmul.mubr.msk.f32.vlgmr.msra.gmra.mxu0 %vm322_vm2, %v1796_v41  ;;  %2018 = vmatprep.subr.mxu0 %v2007_v35  ;;  %v2410_v41 = vshrl.u32 %v76_v30, 7  ;;  %v720_v30 = vld [vmem:[#allocation2 + $0xc8] sm:$0xff] }
 0x211   :  { %2015 = vmatprep.mubr.msk.f32.mxu0 %vm322_vm2, %v1797_v44  ;;  %2019 = vmatpush3.msra.mxu0 %v2007_v35  ;;  %v718_v44 = vld [vmem:[#allocation2 + $0xb8] sm:$0xff] }
 0x212   :  { %2020 = vmatprep.subr.mxu0 %v305_v36  ;;  %vm133_vm11 = vcmp.eq.s32.totalorder %v2410_v41, %v2417_v42  ;;  %2054 = vmatprep.subr.mxu1 %v720_v30 }
 0x213   :  { %2021 = vmatpush3.msra.mxu0 %v305_v36  ;;  %2055 = vmatpush3.msra.mxu1 %v720_v30  ;;  %v2489_v30 = vld [vmem:[#allocation2 + $0x120] sm:$0xff] }
 0x214   :  { %2016 = vmatmul.mubr.msk.f32.gmra.mxu0 %vm322_vm2, %v1798_v47  ;;  %2028 = vmatprep.subr.mxu0 %v47_v45  ;;  %v716_v47 = vld [vmem:[#allocation2 + $0xa8] sm:$0xff] }
 0x215   :  { %2022 = vmatprep.mubr.msk.f32.mxu0 %vm322_vm2, %v2347_v46  ;;  %2056 = vmatprep.subr.mxu1 %v719_v43 }
 0x216   :  { %2057 = vmatpush3.msra.mxu1 %v719_v43  ;;  %v2493_v43 = vld [vmem:[#allocation2 + $0x118] sm:$0xff] }
 0x217   :  { %2058 = vmatprep.subr.mxu1 %v718_v44 }
 0x218   :  { %2059 = vmatpush3.msra.mxu1 %v718_v44  ;;  %v2496_v44 = vld [vmem:[#allocation2 + $0x110] sm:$0xff] }
 0x21a   :  { %v83_v48 = vpop.permute.xlu1 %82 }
 0x21b   :  { %vm91_vm7 = vcmp.eq.s32.totalorder %v83_v48, %v77_v31  ;;  %v715_v48 = vld [vmem:[#allocation2 + $0xa0] sm:$0xff] }
 0x21c   :  { %v2354_v50 = vsel %vm91_vm7, 1.0, %v2277_v33 }
 0x21d   :  { %2023 = vmatmul.mubr.msk.f32.vlgmr.msra.gmra.mxu0 %vm322_vm2, %v2354_v50 }
 0x21e   :  { %v86_v51 = vpop.permute.xlu1 %85  ;;  %2029 = vmatpush3.msra.mxu0 %v47_v45  ;;  %v717_v45 = vld [vmem:[#allocation2 + $0xb0] sm:$0xff] }
 0x21f   :  { %vm92_vm9 = vcmp.eq.s32.totalorder %v86_v51, %v77_v31  ;;  %2060 = vmatprep.subr.mxu1 %v717_v45 }
 0x220   :  { %v2359_v52 = vsel %vm92_vm9, 1.0, %v2277_v33  ;;  %2061 = vmatpush3.msra.mxu1 %v717_v45 }
 0x221   :  { %2025 = vmatprep.mubr.msk.f32.mxu0 %vm322_vm2, %v2359_v52  ;;  %2062 = vmatprep.subr.mxu1 %v716_v47 }
 0x222   :  { %2026 = vmatmul.mubr.msk.f32.gmra.mxu0 %vm322_vm2, %v2362_v53  ;;  %2063 = vmatpush3.msra.mxu1 %v716_v47 }
 0x223   :  { %2030 = vmatprep.mubr.msk.f32.mxu0 %vm157_vm0, %v2311_v1  ;;  %2064 = vmatprep.subr.mxu1 %v715_v48 }
 0x224   :  { %2065 = vmatpush3.msra.mxu1 %v715_v48 }
 0x226   :  { %2031 = vmatmul.mubr.msk.f32.vlgmr.msra.gmra.mxu0 %vm157_vm0, %v2316_v2 }
 0x227   :  { %2037 = vmatprep.mubr.msk.f32.mxu0 %vm322_vm2, %v2347_v46 }
 0x2d0   :  { %v2014_v54 = vpop.f32.mrf.mxu0 }
 0x2d2   :  { %v401_v55 = vpop.f32.mrf.mxu0 }
 0x2d4   :  { %v2017_v56 = vpop.f32.mrf.mxu0 }
 0x2d6   :  { %v411_v57 = vpop.f32.mrf.mxu0 }
 0x2dd   :  { %v2024_v59 = vpop.f32.mrf.mxu0 }
 0x2de   :  { %v504_v60 = vadd.f32 %v2024_v59, %v2014_v54 }
 0x2df   :  { %v498_v61 = vpop.f32.mrf.mxu0 }
 0x2e0   :  { %v522_v62 = vadd.f32 %v1815_v58, %v504_v60  ;;  %v499_v63 = vadd.f32 %v498_v61, %v401_v55 }
 0x2e2   :  { %v1817_v0 = vmul.f32 -6.0, %v522_v62  ;;  %v521_v3 = vadd.f32 %v1815_v58, %v499_v63  ;;  %v2027_v4 = vpop.f32.mrf.mxu0 }
 0x2e3   :  { %v514_v1 = vadd.f32 %v2027_v4, %v2017_v56 }
 0x2e4   :  { %v535_v5 = vmul.f32 1.442695, %v1817_v0  ;;  %v1816_v6 = vmul.f32 -6.0, %v521_v3  ;;  %v508_v2 = vpop.f32.mrf.mxu0 }
 0x2e5   :  { %v524_v8 = vadd.f32 %v1815_v58, %v514_v1  ;;  %v509_v9 = vadd.f32 %v508_v2, %v411_v57 }
 0x2e6   :  { %2208 = vpow2.f32 %v535_v5  ;;  %v533_v10 = vmul.f32 1.442695, %v1816_v6  ;;  %v2032_v11 = vpop.f32.mrf.mxu0 }
 0x2e7   :  { %v1819_v12 = vmul.f32 -6.0, %v524_v8  ;;  %v523_v13 = vadd.f32 %v1815_v58, %v509_v9  ;;  %v2374_v14 = vadd.f32 %v2032_v11, %v1820_v7 }
 0x2e8   :  { %2210 = vpow2.f32 %v533_v10  ;;  %v704_v15 = vpop.f32.mrf.mxu0 }
 0x2e9   :  { %v539_v16 = vmul.f32 1.442695, %v1819_v12  ;;  %v1818_v17 = vmul.f32 -6.0, %v523_v13  ;;  %v2376_v18 = vadd.f32 %v1820_v7, %v704_v15  ;;  %2033 = vmatprep.subr.mxu0 %v2374_v14  ;;  %v128_v12 = vadd.s32 8, %v2410_v41 }
 0x2ea   :  { %2034 = vmatpush3.msra.mxu0 %v2374_v14 }
 0x2eb   :  { %2212 = vpow2.f32 %v539_v16  ;;  %v537_v19 = vmul.f32 1.442695, %v1818_v17  ;;  %2035 = vmatprep.subr.mxu0 %v2376_v18  ;;  %vm134_vm14 = vcmp.eq.s32.totalorder %v128_v12, %v2417_v42  ;;  %v2485_v42 = vld [vmem:[#allocation2 + $0x128] sm:$0xff] }
 0x2ec   :  { %2036 = vmatpush3.msra.mxu0 %v2376_v18 }
 0x2ed   :  { %2214 = vpow2.f32 %v537_v19  ;;  %2038 = vmatmul.mubr.msk.f32.vlgmr.msra.gmra.mxu0 %vm322_vm2, %v2354_v50 }
 0x2ee   :  { %2040 = vmatprep.mubr.msk.f32.mxu0 %vm322_vm2, %v2359_v52 }
 0x2f1   :  { %2041 = vmatmul.mubr.msk.f32.gmra.mxu0 %vm322_vm2, %v2362_v53 }
 0x2f3   :  { %v2209_v20 = vpop.eup %2208 }
 0x2f4   :  { %v542_v22 = vadd.f32 1.0, %v2209_v20 }
 0x2f5   :  { %v2211_v23 = vpop.eup %2210 }
 0x2f6   :  { %2216 = vrcp.f32 %v542_v22  ;;  %v541_v24 = vadd.f32 1.0, %v2211_v23 }
 0x2f8   :  { %v2213_v25 = vpop.eup %2212  ;;  %2218 = vrcp.f32 %v541_v24 }
 0x2f9   :  { %v544_v26 = vadd.f32 1.0, %v2213_v25 }
 0x2fa   :  { %v2215_v27 = vpop.eup %2214 }
 0x2fb   :  { %2220 = vrcp.f32 %v544_v26  ;;  %v543_v28 = vadd.f32 1.0, %v2215_v27  ;;  %v2453_v26 = vsel %vm134_vm14, 1.0, %v2277_v33  ;;  %v714_v27 = vld [vmem:[#allocation2 + $0x98] sm:$0xff] }
 0x2fc   :  { %2066 = vmatprep.subr.mxu1 %v714_v27 }
 0x2fd   :  { %2222 = vrcp.f32 %v543_v28  ;;  %2067 = vmatpush3.msra.mxu1 %v714_v27  ;;  %v713_v28 = vld [vmem:[#allocation2 + $0x90] sm:$0xff] }
 0x2fe   :  { %2068 = vmatprep.subr.mxu1 %v713_v28 }
 0x2ff   :  { %2069 = vmatpush3.msra.mxu1 %v713_v28 }
 0x303   :  { %v2217_v31 = vpop.eup %2216 }
 0x304   :  { %v1769_v32 = vsel %vm1767_vm10, %v2217_v31, 0.0  ;;  %560 = vperm.xlu1 %2196, %v2217_v31  }
 0x305   :  { %v2219_v34 = vpop.eup %2218  ;;  %1782 = vst [vmem:[%s2613_s3 + $0x8] sm:$0xff] %v1769_v32  ;;  %v2459_v32 = vld [vmem:[#allocation2 + $0x140] sm:$0xff] }
 0x306   :  { %v1768_v35 = vsel %vm1767_vm10, %v2219_v34, 0.0  ;;  %574 = vperm.xlu0 %2200, %v2219_v34  }
 0x307   :  { %1781 = vst [vmem:[%s2613_s3] sm:$0xff] %v1768_v35  ;;  %v2467_v35 = vld [vmem:[#allocation2 + $0x130] sm:$0xff] }
 0x308   :  { %v2221_v36 = vpop.eup %2220  ;;  %2197 = vset.pattern.permute.xlu1 %v2275_v21  ;;  %v2280_v21 = vmov 3  }
 0x309   :  { %v1771_v37 = vsel %vm1767_vm10, %v2221_v36, 0.0  ;;  %578 = vperm.xlu1 %2197, %v2217_v31  }
 0x30a   :  { %v2223_v38 = vpop.eup %2222  ;;  %1784 = vst [vmem:[%s2613_s3 + $0x18] sm:$0xff] %v1771_v37  ;;  %586 = vperm.xlu0 %2200, %v2221_v36  }
 0x30b   :  { %v1770_v39 = vsel %vm1767_vm10, %v2223_v38, 0.0 }
 0x30c   :  { %1783 = vst [vmem:[%s2613_s3 + $0x10] sm:$0xff] %v1770_v39 }
 0x30d   :  { %2198 = vset.pattern.permute.xlu1 %v2279_v40 }
 0x30e   :  { %594 = vperm.xlu1 %2198, %v2217_v31   ;;  %582 = vperm.xlu0 %2200, %v2223_v38  }
 0x312   :  { %2199 = vset.pattern.permute.xlu1 %v2276_v29  ;;  %2206 = vset.pattern.permute.xlu0 %v2279_v40 }
 0x313   :  { %555 = vperm.xlu1 %2199, %v2219_v34   ;;  %598 = vperm.xlu0 %2206, %v2223_v38  }
 0x317   :  { %570 = vperm.xlu1 %2199, %v2221_v36   ;;  %2207 = vset.pattern.permute.xlu0 %v2280_v21 }
 0x318   :  { %614 = vperm.xlu0 %2207, %v2223_v38  }
 0x31b   :  { %2201 = vset.pattern.permute.xlu1 %v2279_v40 }
 0x31c   :  { %602 = vperm.xlu1 %2201, %v2221_v36   ;;  %606 = vperm.xlu0 %2207, %v2219_v34  }
 0x320   :  { %2202 = vset.pattern.permute.xlu1 %v2280_v21 }
 0x321   :  { %618 = vperm.xlu1 %2202, %v2221_v36  }
 0x325   :  { %2203 = vset.pattern.permute.xlu1 %v2276_v29  ;;  %v2422_v29 = vsel %vm133_vm11, 1.0, %v2277_v33 }
 0x326   :  { %565 = vperm.xlu1 %2203, %v2223_v38   ;;  %2051 = vmatprep.mubr.msk.f32.mxu0 %vm811_vm12, %v2422_v29 }
 0x32a   :  { %2204 = vset.pattern.permute.xlu1 %v2280_v21 }
 0x32b   :  { %610 = vperm.xlu1 %2204, %v2217_v31   ;;  %v2457_v31 = vld [vmem:[#allocation2 + $0x148] sm:$0xff] }
 0x32f   :  { %2205 = vset.pattern.permute.xlu1 %v2279_v40 }
 0x330   :  { %590 = vperm.xlu1 %2205, %v2219_v34   ;;  %v2463_v34 = vld [vmem:[#allocation2 + $0x138] sm:$0xff] }
 0x334   :  { %895 = vrot.lane.b32.xlu1 %v2376_v18, %s2281_s11 }
 0x338   :  { %897 = vrot.lane.b32.xlu1 %v2374_v14, %s2281_s11 }
 0x37f   :  { %v561_v49 = vpop.permute.xlu1 %560 }
 0x381   :  { %v575_v57 = vpop.permute.xlu0 %574 }
 0x384   :  { %v579_v51 = vpop.permute.xlu1 %578 }
 0x385   :  { %v587_v59 = vpop.permute.xlu0 %586  ;;  %v622_v13 = vsel %vm157_vm0, %v561_v49, %v579_v51 }
 0x389   :  { %v595_v54 = vpop.permute.xlu1 %594  ;;  %v583_v61 = vpop.permute.xlu0 %582 }
 0x38a   :  { %v626_v17 = vsel %vm322_vm2, %v622_v13, %v595_v54 }
 0x38e   :  { %v556_v55 = vpop.permute.xlu1 %555  ;;  %v599_v63 = vpop.permute.xlu0 %598 }
 0x38f   :  { %v621_v14 = vsel %vm157_vm0, %v556_v55, %v575_v57  ;;  %v2509_v57 = vld [vmem:[#allocation2 + $0x191] ss:$0 sm:$0xff] }
 0x392   :  { %v571_v56 = vpop.permute.xlu1 %570 }
 0x393   :  { %v624_v1 = vsel %vm157_vm0, %v571_v56, %v587_v59  ;;  %v615_v6 = vpop.permute.xlu0 %614 }
 0x397   :  { %v603_v58 = vpop.permute.xlu1 %602  ;;  %v607_v22 = vpop.permute.xlu0 %606 }
 0x398   :  { %v628_v2 = vsel %vm322_vm2, %v624_v1, %v603_v58 }
 0x39c   :  { %v619_v60 = vpop.permute.xlu1 %618 }
 0x39d   :  { %v2431_v9 = vsel %vm629_vm13, %v628_v2, %v619_v60 }
 0x3a1   :  { %v566_v62 = vpop.permute.xlu1 %565 }
 0x3a2   :  { %v623_v3 = vsel %vm157_vm0, %v566_v62, %v583_v61 }
 0x3a3   :  { %v627_v7 = vsel %vm322_vm2, %v623_v3, %v599_v63 }
 0x3a4   :  { %v2438_v15 = vsel %vm629_vm13, %v627_v7, %v615_v6 }
 0x3a6   :  { %v611_v0 = vpop.permute.xlu1 %610 }
 0x3a7   :  { %v2444_v20 = vsel %vm629_vm13, %v626_v17, %v611_v0 }
 0x3ab   :  { %v591_v8 = vpop.permute.xlu1 %590 }
 0x3ac   :  { %v625_v18 = vsel %vm322_vm2, %v621_v14, %v591_v8 }
 0x3ad   :  { %v2039_v4 = vpop.f32.mrf.mxu0  ;;  %v2449_v24 = vsel %vm629_vm13, %v625_v18, %v607_v22 }
 0x3ae   :  { %v808_v23 = vmul.f32 %v2039_v4, %v2444_v20 }
 0x3af   :  { %v788_v5 = vpop.f32.mrf.mxu0  ;;  %v2473_v36 = vpop.permute.xlu1 %895 }
 0x3b0   :  { %v807_v25 = vmul.f32 %v788_v5, %v2449_v24 }
 0x3b1   :  { %v2042_v10 = vpop.f32.mrf.mxu0 }
 0x3b2   :  { %v810_v11 = vmul.f32 %v2042_v10, %v2431_v9 }
 0x3b3   :  { %v798_v16 = vpop.f32.mrf.mxu0  ;;  %v2475_v39 = vpop.permute.xlu1 %897 }
 0x3b4   :  { %v809_v19 = vmul.f32 %v798_v16, %v2438_v15  ;;  %2043 = vmatprep.subr.mxu0 %v810_v11 }
 0x3b5   :  { %2044 = vmatpush3.msra.mxu0 %v810_v11 }
 0x3b6   :  { %2045 = vmatprep.subr.mxu0 %v809_v19 }
 0x3b7   :  { %2046 = vmatpush3.msra.mxu0 %v809_v19 }
 0x3b8   :  { %2047 = vmatprep.subr.mxu0 %v808_v23 }
 0x3b9   :  { %2048 = vmatpush3.msra.mxu0 %v808_v23 }
 0x3ba   :  { %2049 = vmatprep.subr.mxu0 %v807_v25 }
 0x3bb   :  { %2050 = vmatpush3.msra.mxu0 %v807_v25 }
 0x3bc   :  { %2052 = vmatmul.mubr.msk.f32.vlgmr.msra.gmra.mxu0 %vm811_vm12, %v2453_v26  ;;  %2073 = vmatprep.subr.mxu0 %v2457_v31 }
 0x3bd   :  { %2074 = vmatpush3.msra.mxu0 %v2457_v31 }
 0x3be   :  { %2075 = vmatprep.subr.mxu0 %v2459_v32 }
 0x3bf   :  { %2076 = vmatpush3.msra.mxu0 %v2459_v32 }
 0x3c0   :  { %2077 = vmatprep.subr.mxu0 %v2463_v34 }
 0x3c1   :  { %2078 = vmatpush3.msra.mxu0 %v2463_v34 }
 0x3c2   :  { %2079 = vmatprep.subr.mxu0 %v2467_v35 }
 0x3c3   :  { %2080 = vmatpush3.msra.mxu0 %v2467_v35 }
 0x3c4   :  { %2081 = vmatprep.subr.mxu0 %v2485_v42 }
 0x3c5   :  { %2082 = vmatpush3.msra.mxu0 %v2485_v42 }
 0x3c6   :  { %2083 = vmatprep.subr.mxu0 %v2489_v30 }
 0x3c7   :  { %2084 = vmatpush3.msra.mxu0 %v2489_v30 }
 0x3c8   :  { %2085 = vmatprep.subr.mxu0 %v2493_v43 }
 0x3c9   :  { %2086 = vmatpush3.msra.mxu0 %v2493_v43 }
 0x3ca   :  { %2087 = vmatprep.subr.mxu0 %v2496_v44 }
 0x3cb   :  { %2088 = vmatpush3.msra.mxu0 %v2496_v44 }
 0x47c   :  { %v2053_v37 = vpop.f32.mrf.mxu0 }
 0x47d   :  { %v902_v21 = vsel %vm811_vm12, %v2053_v37, %v2475_v39 }
 0x47e   :  { %v884_v38 = vpop.f32.mrf.mxu0 }
 0x47f   :  { %v901_v40 = vsel %vm811_vm12, %v884_v38, %v2473_v36 }
 0x480   :  { %2070 = vmatprep.mubr.msk.f32.mxu1 %vm907_vm15, %v901_v40 }
 0x481   :  { %2071 = vmatmul.mubr.msk.f32.vlgmr.msra.gmra.mxu1 %vm907_vm15, %v902_v21  ;;  %v1134_v21 = vld [vmem:[#allocation2 + $0x100] sm:$0xff] }
 0x482   :  { %2096 = vmatprep.mubr.msk.f32.mxu1 %vm322_vm2, %v2347_v46  ;;  %v1829_v46 = vld [vmem:[#allocation2 + $0x194] ss:$0 sm:$0xff] }
 0x541   :  { %v2072_v45 = vpop.f32.mrf.mxu1 }
 0x542   :  { %v986_v47 = vadd.f32 %v2072_v45, %v1829_v46  ;;  %v1132_v45 = vld [vmem:[#allocation2 + $0xf0] sm:$0xff] }
 0x543   :  { %v980_v48 = vpop.f32.mrf.mxu1 }
 0x544   :  { %v981_v49 = vadd.f32 %v1829_v46, %v980_v48  ;;  %v990_v51 = vmax.f32 %v986_v47, 0.0  ;;  %v1133_v46 = vld [vmem:[#allocation2 + $0xf8] sm:$0xff]  ;;  %v1131_v47 = vld [vmem:[#allocation2 + $0xe8] sm:$0xff] }
 0x546   :  { %v989_v54 = vmax.f32 %v981_v49, 0.0  ;;  %v992_v56 = vsel %vm811_vm12, %v990_v51, %v2475_v39 }
 0x548   :  { %v991_v55 = vsel %vm811_vm12, %v989_v54, %v2473_v36 }
 0x549   :  { %2089 = vmatprep.mubr.msk.f32.mxu0 %vm907_vm15, %v991_v55 }
 0x54a   :  { %2090 = vmatmul.mubr.msk.f32.vlgmr.msra.gmra.mxu0 %vm907_vm15, %v992_v56 }
 0x54b   :  { %2110 = vmatprep.mubr.msk.f32.mxu0 %vm811_vm12, %v2422_v29 }
 0x60a   :  { %v2091_v58 = vpop.f32.mrf.mxu0 }
 0x60b   :  { %v1075_v59 = vadd.f32 %v2091_v58, %v2509_v57 }
 0x60c   :  { %v1069_v60 = vpop.f32.mrf.mxu0 }
 0x60d   :  { %v1070_v61 = vadd.f32 %v2509_v57, %v1069_v60  ;;  %1094 = vrot.lane.b32.xlu0 %v1075_v59, %s2281_s11  ;;  %v1836_v62 = vmul.f32 -1.442695, %v1075_v59 }
 0x60f   :  { %1092 = vrot.lane.b32.xlu1 %v1070_v61, %s2281_s11  ;;  %v1835_v63 = vmul.f32 -1.442695, %v1070_v61  ;;  %2224 = vpow2.f32 %v1836_v62 }
 0x611   :  { %2226 = vpow2.f32 %v1835_v63 }
 0x61c   :  { %v2225_v0 = vpop.eup %2224 }
 0x61d   :  { %v1085_v4 = vadd.f32 1.0, %v2225_v0 }
 0x61e   :  { %v2227_v3 = vpop.eup %2226 }
 0x61f   :  { %v1084_v29 = vadd.f32 1.0, %v2227_v3  ;;  %2228 = vrcp.f32 %v1085_v4 }
 0x621   :  { %2230 = vrcp.f32 %v1084_v29 }
 0x62c   :  { %v2229_v1 = vpop.eup %2228 }
 0x62d   :  { %v1113_v17 = vsub.f32 1.0, %v2229_v1  ;;  %v1125_v19 = vmul.f32 %v2229_v1, %v2475_v39 }
 0x62e   :  { %v2231_v2 = vpop.eup %2230 }
 0x62f   :  { %v1112_v23 = vsub.f32 1.0, %v2231_v2  ;;  %v1124_v28 = vmul.f32 %v2231_v2, %v2473_v36  ;;  %v1135_v36 = vld [vmem:[#allocation2 + $0x108] sm:$0xff] }
 0x67f   :  { %v1095_v5 = vpop.permute.xlu0 %1094 }
 0x680   :  { %v1099_v6 = vmul.f32 %v2229_v1, %v1095_v5 }
 0x681   :  { %v1093_v7 = vpop.permute.xlu1 %1092 }
 0x682   :  { %v1098_v8 = vmul.f32 %v2231_v2, %v1093_v7  ;;  %1104 = vrot.lane.b32.xlu0 %v1099_v6, %s2282_s14 }
 0x684   :  { %1102 = vrot.lane.b32.xlu1 %v1098_v8, %s2282_s14 }
 0x6f4   :  { %v1105_v10 = vpop.permute.xlu0 %1104 }
 0x6f5   :  { %v1109_v11 = vadd.f32 %v1105_v10, %v1075_v59 }
 0x6f6   :  { %v1103_v12 = vpop.permute.xlu1 %1102 }
 0x6f7   :  { %2232 = vtanh.f32 %v1109_v11  ;;  %v1108_v13 = vadd.f32 %v1103_v12, %v1070_v61 }
 0x6f9   :  { %2234 = vtanh.f32 %v1108_v13 }
 0x704   :  { %v2233_v14 = vpop.eup %2232 }
 0x705   :  { %1118 = vrot.lane.b32.xlu0 %v2233_v14, %s2283_s15 }
 0x706   :  { %v2235_v16 = vpop.eup %2234 }
 0x707   :  { %1116 = vrot.lane.b32.xlu1 %v2235_v16, %s2283_s15 }
 0x777   :  { %v1119_v18 = vpop.permute.xlu0 %1118 }
 0x778   :  { %v1123_v22 = vmul.f32 %v1119_v18, %v1113_v17  ;;  %v1802_v18 = vld [vmem:[%s2610_s0 + $0x21] ss:$0 sm:$0xff] }
 0x779   :  { %v1117_v25 = vpop.permute.xlu1 %1116  ;;  %vm143_vm0 = vcmp.eq.s32.totalorder %v2410_v41, %v1802_v18 }
 0x77a   :  { %v2520_v27 = vadd.f32 %v1125_v19, %v1123_v22  ;;  %v1122_v37 = vmul.f32 %v1117_v25, %v1112_v23  ;;  %v1803_v19 = vsel %vm143_vm0, 1.0, %v2277_v33 }
 0x77b   :  { %v147_v22 = vsel %vm146_vm1, %v1803_v19, 0.0 }
 0x77c   :  { %v2523_v38 = vadd.f32 %v1124_v28, %v1122_v37  ;;  %1141 = vrot.lane.b32.xlu0 %v2520_v27, %s2283_s15 }
 0x77e   :  { %1139 = vrot.lane.b32.xlu1 %v2523_v38, %s2283_s15 }
 0x7ee   :  { %v1142_v40 = vpop.permute.xlu0 %1141 }
 0x7ef   :  { %2092 = vmatprep.subr.mxu1 %v1142_v40 }
 0x7f0   :  { %2093 = vmatpush3.msra.mxu1 %v1142_v40  ;;  %v1140_v39 = vpop.permute.xlu1 %1139 }
 0x7f1   :  { %2094 = vmatprep.subr.mxu1 %v1140_v39 }
 0x7f2   :  { %2095 = vmatpush3.msra.mxu1 %v1140_v39 }
 0x7f3   :  { %2097 = vmatmul.mubr.msk.f32.vlgmr.msra.gmra.mxu1 %vm322_vm2, %v2354_v50  ;;  %2113 = vmatprep.subr.mxu1 %v1135_v36  ;;  %v1130_v50 = vld [vmem:[#allocation2 + $0xe0] sm:$0xff] }
 0x7f4   :  { %2099 = vmatprep.mubr.msk.f32.mxu1 %vm322_vm2, %v2359_v52  ;;  %2114 = vmatpush3.msra.mxu1 %v1135_v36 }
 0x7f5   :  { %2115 = vmatprep.subr.mxu1 %v1134_v21 }
 0x7f6   :  { %2116 = vmatpush3.msra.mxu1 %v1134_v21 }
 0x7f7   :  { %2100 = vmatmul.mubr.msk.f32.gmra.mxu1 %vm322_vm2, %v2362_v53  ;;  %2117 = vmatprep.subr.mxu1 %v1133_v46 }
 0x7f8   :  { %2118 = vmatpush3.msra.mxu1 %v1133_v46 }
 0x7f9   :  { %2119 = vmatprep.subr.mxu1 %v1132_v45 }
 0x7fa   :  { %2120 = vmatpush3.msra.mxu1 %v1132_v45 }
 0x7fb   :  { %2121 = vmatprep.subr.mxu1 %v1131_v47 }
 0x7fc   :  { %2122 = vmatpush3.msra.mxu1 %v1131_v47 }
 0x7fd   :  { %2123 = vmatprep.subr.mxu1 %v1130_v50 }
 0x7fe   :  { %2124 = vmatpush3.msra.mxu1 %v1130_v50 }
 0x8b3   :  { %v2098_v52 = vpop.f32.mrf.mxu1 }
 0x8b4   :  { %v1231_v55 = vmul.f32 %v2098_v52, %v2444_v20 }
 0x8b5   :  { %v1211_v53 = vpop.f32.mrf.mxu1 }
 0x8b6   :  { %v1230_v56 = vmul.f32 %v1211_v53, %v2449_v24 }
 0x8b7   :  { %v2101_v48 = vpop.f32.mrf.mxu1 }
 0x8b8   :  { %v1233_v49 = vmul.f32 %v2101_v48, %v2431_v9  ;;  %v1129_v9 = vld [vmem:[#allocation2 + $0xd8] sm:$0xff]  ;;  %v59_v48 = vld [vmem:[#allocation2 + $0x168] sm:$0xff] }
 0x8b9   :  { %v1221_v51 = vpop.f32.mrf.mxu1  ;;  %2125 = vmatprep.subr.mxu1 %v1129_v9 }
 0x8ba   :  { %v1232_v54 = vmul.f32 %v1221_v51, %v2438_v15  ;;  %2102 = vmatprep.subr.mxu0 %v1233_v49  ;;  %2126 = vmatpush3.msra.mxu1 %v1129_v9  ;;  %v1128_v15 = vld [vmem:[#allocation2 + $0xd0] sm:$0xff]  ;;  %v62_v9 = vld [vmem:[#allocation2 + $0x180] sm:$0xff] }
 0x8bb   :  { %2103 = vmatpush3.msra.mxu0 %v1233_v49  ;;  %2127 = vmatprep.subr.mxu1 %v1128_v15  ;;  %v57_v49 = vld [vmem:[#allocation2 + $0x158] sm:$0xff]  ;;  %v56_v51 = vld [vmem:[#allocation2 + $0x150] sm:$0xff] }
 0x8bc   :  { %2104 = vmatprep.subr.mxu0 %v1232_v54  ;;  %2128 = vmatpush3.msra.mxu1 %v1128_v15  ;;  %v61_v15 = vld [vmem:[#allocation2 + $0x178] sm:$0xff] }
 0x8bd   :  { %2105 = vmatpush3.msra.mxu0 %v1232_v54  ;;  %2151 = vmatprep.subr.mxu1 %v2277_v33  ;;  %v63_v54 = vld [vmem:[#allocation2 + $0x188] sm:$0xff] }
 0x8be   :  { %2106 = vmatprep.subr.mxu0 %v1231_v55 }
 0x8bf   :  { %2107 = vmatpush3.msra.mxu0 %v1231_v55 }
 0x8c0   :  { %2108 = vmatprep.subr.mxu0 %v1230_v56 }
 0x8c1   :  { %2109 = vmatpush3.msra.mxu0 %v1230_v56 }
 0x8c2   :  { %2111 = vmatmul.mubr.msk.f32.vlgmr.msra.gmra.mxu0 %vm811_vm12, %v2453_v26  ;;  %2132 = vmatprep.subr.mxu0 %v2457_v31 }
 0x8c3   :  { %2133 = vmatpush3.msra.mxu0 %v2457_v31 }
 0x8c4   :  { %2134 = vmatprep.subr.mxu0 %v2459_v32 }
 0x8c5   :  { %2135 = vmatpush3.msra.mxu0 %v2459_v32  ;;  %v1843_v32 = vld [vmem:[#allocation2 + $0x195] ss:$0 sm:$0xff] }
 0x8c6   :  { %2136 = vmatprep.subr.mxu0 %v2463_v34 }
 0x8c7   :  { %2137 = vmatpush3.msra.mxu0 %v2463_v34 }
 0x8c8   :  { %2138 = vmatprep.subr.mxu0 %v2467_v35 }
 0x8c9   :  { %2139 = vmatpush3.msra.mxu0 %v2467_v35 }
 0x8ca   :  { %2140 = vmatprep.subr.mxu0 %v2485_v42 }
 0x8cb   :  { %2141 = vmatpush3.msra.mxu0 %v2485_v42 }
 0x8cc   :  { %2142 = vmatprep.subr.mxu0 %v2489_v30 }
 0x8cd   :  { %2143 = vmatpush3.msra.mxu0 %v2489_v30 }
 0x8ce   :  { %2144 = vmatprep.subr.mxu0 %v2493_v43 }
 0x8cf   :  { %2145 = vmatpush3.msra.mxu0 %v2493_v43 }
 0x8d0   :  { %2146 = vmatprep.subr.mxu0 %v2496_v44 }
 0x8d1   :  { %2147 = vmatpush3.msra.mxu0 %v2496_v44 }
 0x8d2   :  { %2169 = vmatprep.subr.mxu0 %v2277_v33 }
 0x982   :  { %v2112_v20 = vpop.f32.mrf.mxu0 }
 0x983   :  { %v1310_v31 = vsel %vm811_vm12, %v2112_v20, %v2520_v27  ;;  %v60_v20 = vld [vmem:[#allocation2 + $0x170] sm:$0xff] }
 0x984   :  { %v1300_v24 = vpop.f32.mrf.mxu0 }
 0x985   :  { %v1309_v26 = vsel %vm811_vm12, %v1300_v24, %v2523_v38  ;;  %v1851_v24 = vld [vmem:[#allocation2 + $0x196] ss:$0 sm:$0xff] }
 0x986   :  { %2129 = vmatprep.mubr.msk.f32.mxu1 %vm907_vm15, %v1309_v26 }
 0x987   :  { %2130 = vmatmul.mubr.msk.f32.vlgmr.msra.gmra.mxu1 %vm907_vm15, %v1310_v31 }
 0x988   :  { %2155 = vmatprep.mubr.msk.f32.mxu1 %vm2284_vm3, %v2277_v33 }
 0xa47   :  { %v2131_v34 = vpop.f32.mrf.mxu1 }
 0xa48   :  { %v1393_v35 = vadd.f32 %v2131_v34, %v1843_v32 }
 0xa49   :  { %v1387_v42 = vpop.f32.mrf.mxu1 }
 0xa4a   :  { %v1388_v30 = vadd.f32 %v1843_v32, %v1387_v42  ;;  %v1397_v43 = vmax.f32 %v1393_v35, 0.0  ;;  %v1853_v35 = vld [vmem:[#allocation2 + $0x197] ss:$0 sm:$0xff] }
 0xa4c   :  { %v1396_v44 = vmax.f32 %v1388_v30, 0.0  ;;  %v1399_v59 = vsel %vm811_vm12, %v1397_v43, %v2520_v27 }
 0xa4e   :  { %v1398_v58 = vsel %vm811_vm12, %v1396_v44, %v2523_v38 }
 0xa4f   :  { %2148 = vmatprep.mubr.msk.f32.mxu0 %vm907_vm15, %v1398_v58 }
 0xa50   :  { %2149 = vmatmul.mubr.msk.f32.vlgmr.msra.gmra.mxu0 %vm907_vm15, %v1399_v59 }
 0xa51   :  { %2177 = vmatprep.mubr.msk.f32.mxu0 %vm2284_vm3, %v2277_v33  ;;  %2170 = vmatpush3.msra.mxu0 %v63_v54 }
 0xa52   :  { %2171 = vmatprep.subr.mxu0 %v2277_v33 }
 0xa53   :  { %2172 = vmatpush3.msra.mxu0 %v62_v9 }
 0xa54   :  { %2173 = vmatprep.subr.mxu0 %v2277_v33 }
 0xa55   :  { %2174 = vmatpush3.msra.mxu0 %v61_v15 }
 0xa56   :  { %2175 = vmatprep.subr.mxu0 %v2277_v33 }
 0xa57   :  { %2176 = vmatpush3.msra.mxu0 %v60_v20 }
 0xb10   :  { %v2150_v60 = vpop.f32.mrf.mxu0 }
 0xb11   :  { %v1478_v61 = vadd.f32 %v2150_v60, %v2509_v57 }
 0xb12   :  { %v1472_v62 = vpop.f32.mrf.mxu0 }
 0xb13   :  { %v1473_v63 = vadd.f32 %v2509_v57, %v1472_v62  ;;  %1497 = vrot.lane.b32.xlu0 %v1478_v61, %s2281_s11  ;;  %v1849_v0 = vmul.f32 -1.442695, %v1478_v61 }
 0xb15   :  { %1495 = vrot.lane.b32.xlu1 %v1473_v63, %s2281_s11  ;;  %v1848_v3 = vmul.f32 -1.442695, %v1473_v63  ;;  %2236 = vpow2.f32 %v1849_v0 }
 0xb17   :  { %2238 = vpow2.f32 %v1848_v3 }
 0xb22   :  { %v2237_v4 = vpop.eup %2236 }
 0xb23   :  { %v1488_v1 = vadd.f32 1.0, %v2237_v4 }
 0xb24   :  { %v2239_v29 = vpop.eup %2238 }
 0xb25   :  { %v1487_v5 = vadd.f32 1.0, %v2239_v29  ;;  %2240 = vrcp.f32 %v1488_v1 }
 0xb27   :  { %2242 = vrcp.f32 %v1487_v5 }
 0xb32   :  { %v2241_v6 = vpop.eup %2240 }
 0xb33   :  { %v1516_v23 = vsub.f32 1.0, %v2241_v6  ;;  %v1528_v28 = vmul.f32 %v2241_v6, %v2520_v27 }
 0xb34   :  { %v2243_v8 = vpop.eup %2242 }
 0xb35   :  { %v1515_v40 = vsub.f32 1.0, %v2243_v8  ;;  %v1527_v21 = vmul.f32 %v2243_v8, %v2523_v38  ;;  %v58_v38 = vld [vmem:[#allocation2 + $0x160] sm:$0xff] }
 0xb85   :  { %v1498_v2 = vpop.permute.xlu0 %1497 }
 0xb86   :  { %v1502_v7 = vmul.f32 %v2241_v6, %v1498_v2 }
 0xb87   :  { %v1496_v10 = vpop.permute.xlu1 %1495 }
 0xb88   :  { %v1501_v57 = vmul.f32 %v2243_v8, %v1496_v10  ;;  %1507 = vrot.lane.b32.xlu0 %v1502_v7, %s2282_s14 }
 0xb8a   :  { %1505 = vrot.lane.b32.xlu1 %v1501_v57, %s2282_s14 }
 0xbfa   :  { %v1508_v11 = vpop.permute.xlu0 %1507 }
 0xbfb   :  { %v1512_v12 = vadd.f32 %v1508_v11, %v1478_v61 }
 0xbfc   :  { %v1506_v13 = vpop.permute.xlu1 %1505 }
 0xbfd   :  { %2244 = vtanh.f32 %v1512_v12  ;;  %v1511_v14 = vadd.f32 %v1506_v13, %v1473_v63 }
 0xbff   :  { %2246 = vtanh.f32 %v1511_v14 }
 0xc0a   :  { %v2245_v16 = vpop.eup %2244 }
 0xc0b   :  { %1521 = vrot.lane.b32.xlu0 %v2245_v16, %s2283_s15 }
 0xc0c   :  { %v2247_v17 = vpop.eup %2246 }
 0xc0d   :  { %1519 = vrot.lane.b32.xlu1 %v2247_v17, %s2283_s15 }
 0xc2a   :  { %148 = vadd.xlane.f32.xlu0 %v147_v22 }
 0xc7d   :  { %v1522_v25 = vpop.permute.xlu0 %1521 }
 0xc7e   :  { %v1526_v37 = vmul.f32 %v1522_v25, %v1516_v23 }
 0xc7f   :  { %v1520_v39 = vpop.permute.xlu1 %1519 }
 0xc80   :  { %v1530_v41 = vadd.f32 %v1528_v28, %v1526_v37  ;;  %v1525_v36 = vmul.f32 %v1520_v39, %v1515_v40 }
 0xc82   :  { %1535 = vrot.lane.b32.xlu1 %v1530_v41, %s2283_s15  ;;  %v1529_v46 = vadd.f32 %v1527_v21, %v1525_v36 }
 0xc86   :  { %1533 = vrot.lane.b32.xlu1 %v1529_v46, %s2283_s15 }
 0xcb3   :  { %v149_v45 = vpop.xlane.xlu0 %148 }
 0xcb4   :  { %v150_v47 = vmax.f32 %v149_v45, 1.0 }
 0xcb6   :  { %2248 = vrcp.f32 %v150_v47 }
 0xcc3   :  { %v2249_v50 = vpop.eup %2248 }
 0xcc4   :  { %v152_v27 = vmul.f32 %v2249_v50, %v1803_v19 }
 0xcf4   :  { %v1536_v52 = vpop.permute.xlu1 %1535 }
 0xcf5   :  { %2152 = vmatpush3.msra.mxu1 %v1536_v52 }
 0xcf6   :  { %2153 = vmatprep.subr.mxu1 %v2277_v33 }
 0xcf8   :  { %v1534_v53 = vpop.permute.xlu1 %1533 }
 0xcf9   :  { %2154 = vmatpush3.msra.mxu1 %v1534_v53 }
 0xcfa   :  { %2156 = vmatmul.mubr.msk.f32.vlgmr.msra.gmra.mxu1 %vm322_vm2, %v152_v27  ;;  %2158 = vmatprep.subr.mxu1 %v2277_v33  ;;  %vm1777_vm2 = vcmask 285696  }
 0xcfb   :  { %2159 = vmatpush3.msra.mxu1 %v59_v48  ;;  %2166 = vmatprep.mubr.msk.f32.mxu1 %vm2284_vm3, %v2277_v33 }
 0xcfc   :  { %2160 = vmatprep.subr.mxu1 %v2277_v33 }
 0xcfd   :  { %2161 = vmatpush3.msra.mxu1 %v58_v38 }
 0xcfe   :  { %2162 = vmatprep.subr.mxu1 %v2277_v33 }
 0xcff   :  { %2163 = vmatpush3.msra.mxu1 %v57_v49 }
 0xd00   :  { %2164 = vmatprep.subr.mxu1 %v2277_v33 }
 0xd01   :  { %2165 = vmatpush3.msra.mxu1 %v56_v51 }
 0xdba   :  { %v1608_v55 = vpop.f32.mrf.mxu1 }
 0xdbb   :  { %2167 = vmatmul.mubr.msk.f32.vlgmr.msra.gmra.mxu1 %vm811_vm12, %v1608_v55 }
 0xdbc   :  { %v2157_v56 = vpop.f32.mrf.mxu1 }
 0xe7b   :  { %v1685_v26 = vpop.f32.mrf.mxu1 }
 0xe7c   :  { %v1686_v31 = vadd.f32 %v1851_v24, %v1685_v26 }
 0xe7d   :  { %v2168_v32 = vpop.f32.mrf.mxu1 }
 0xe7e   :  { %v1689_v34 = vmax.f32 %v1686_v31, 0.0 }
 0xe80   :  { %2178 = vmatmul.mubr.msk.f32.vlgmr.msra.gmra.mxu0 %vm811_vm12, %v1689_v34 }
 0xf40   :  { %v1763_v42 = vpop.f32.mrf.mxu0 }
 0xf41   :  { %v1764_v30 = vadd.f32 %v1853_v35, %v1763_v42 }
 0xf42   :  { %v2179_v43 = vpop.f32.mrf.mxu0 }
 0xf43   :  { %1773 = vrot.lane.b32.xlu1 %v1764_v30, %s2281_s11 }
 0xfb5   :  { %v1774_v44 = vpop.permute.xlu1 %1773 }
 0xfb6   :  { %v1776_v33 = vsel %vm811_vm12, %v1608_v55, %v1774_v44 }
 0xfb7   :  { %v1778_v58 = vsel %vm1777_vm2, %v1776_v33, 0.0 }
 0xfb8   :  { %v1780_v59 = vsel %vm1779_vm4, %v1778_v58, 0.0 }
 0xfb9   :  { %1785 = vst [vmem:[%s2613_s3 + $0x20] sm:$0xff] %v1780_v59 }
 0xfba   :  { %1790 = vsyncpa [#allocation3], 1 }

</bundles_post_ra>
